<compile_context>
chip_gen: v6e
topology: v6e:2x2x1
jax: 0.10.0
libtpu: 0.0.40
codegen_flags: <defaults>
</compile_context>

<pallas_src>
import functools

import jax
import jax.numpy as jnp
from jax.experimental import pallas as pl
from jax.experimental.pallas import tpu as pltpu

LANE = 128
_MIB = 1024 * 1024


def _round_up(v, m):
    return (v + m - 1) // m * m


def _device_traits():
    """Returns (two_tensorcores, vmem_limit_bytes), with a safe fallback."""
    kind = ""
    try:
        kind = jax.devices()[0].device_kind.lower()
    except Exception:
        pass
    two_tc = ("v7" in kind) or ("tpu7" in kind)          # v7x: 2 TCs / chip, 64 MiB VMEM
    big_vmem = (("v5" in kind) or ("v6" in kind)) and not two_tc   # 128 MiB VMEM parts
    vmem_limit = (96 if big_vmem else 48) * _MIB
    return two_tc, vmem_limit


def _plan_tiles(n, two_tc):
    """(n_pad, tile_i, tile_k) for the N x N aggregation matmul.

    n is padded to the tile size so tiles never degrade to 128; k-tiles are 1024 on
    single-TC chips (v5e/v6e), 512 on v7x; on dual-TC chips the row tile is shrunk when
    needed so the 'parallel' row axis has >= 2 blocks.
    """
    n128 = _round_up(max(n, 1), LANE)
    if n128 <= 128:
        return 128, 128, 128
    if n128 <= 256:
        return 256, (128 if two_tc else 256), 256
    n_pad = _round_up(n, 512)
    ti = 512
    tk = 512 if (two_tc or n_pad % 1024 != 0) else 1024
    if two_tc and n_pad == 512:
        ti = 256
    return n_pad, ti, tk


# ----------------------------- Pallas kernels ------------------------------

def _gcn_layer_kernel(*refs, pre_projected, double_prelu):
    """One fused GraphConv(+PReLU) layer.

    grid = (row blocks i ["parallel"], reduction blocks k ["arbitrary"]) over A (N x N).
      pre_projected:  out[i] = PReLU( (A @ (x W_rel))[i] + b_rel + x[i] @ W_root )
      otherwise:      out[i] = PReLU( (A @ x)[i] @ W_rel + b_rel + x[i] @ W_root )
    (optionally PReLU applied twice, matching the encoder's h_l[0]).
    """
    if pre_projected:
        (a_ref, xk_ref, xi_ref, wroot_ref, brel_ref, alpha_ref,
         o_ref, acc_ref) = refs
        wrel_ref = None
    else:
        (a_ref, xk_ref, xi_ref, wrel_ref, wroot_ref, brel_ref, alpha_ref,
         o_ref, acc_ref) = refs

    k = pl.program_id(1)
    nk = pl.num_programs(1)

    @pl.when(k == 0)
    def _init():
        acc_ref[...] = jnp.zeros_like(acc_ref)

    acc_ref[...] += jnp.dot(a_ref[...], xk_ref[...],
                            preferred_element_type=jnp.float32)

    @pl.when(k == nk - 1)
    def _finalize():
        if pre_projected:
            out = acc_ref[...]
        else:
            out = jnp.dot(acc_ref[...].astype(wrel_ref.dtype), wrel_ref[...],
                          preferred_element_type=jnp.float32)
        out = out + brel_ref[...]
        out = out + jnp.dot(xi_ref[...], wroot_ref[...],
                            preferred_element_type=jnp.float32)
        alpha = alpha_ref[...]
        out = jnp.where(out >= 0.0, out, alpha * out)
        if double_prelu:   # encoder applies activations[0] twice for h_l[0]
            out = jnp.where(out >= 0.0, out, alpha * out)
        o_ref[...] = out.astype(o_ref.dtype)


def _linear_kernel(x_ref, w_ref, o_ref):
    o_ref[...] = jnp.dot(x_ref[...], w_ref[...],
                         preferred_element_type=jnp.float32).astype(o_ref.dtype)


def _linear_add_kernel(add_ref, x_ref, w_ref, o_ref):
    # Fused skip path: out = add + x @ W   (removes the bare XLA elementwise add).
    o_ref[...] = (add_ref[...].astype(jnp.float32)
                  + jnp.dot(x_ref[...], w_ref[...],
                            preferred_element_type=jnp.float32)
                  ).astype(o_ref.dtype)


# ------------------------------ wrappers ------------------------------------

def dense(x, w_t, add=None, *, tile, out_dtype, vmem_limit):
    n_pad, f_in = x.shape
    f_out = w_t.shape[1]
    grid = (n_pad // tile,)
    x_spec = pl.BlockSpec((tile, f_in), lambda i: (i, 0))
    w_spec = pl.BlockSpec((f_in, f_out), lambda i: (0, 0))
    o_spec = pl.BlockSpec((tile, f_out), lambda i: (i, 0))
    params = pltpu.CompilerParams(dimension_semantics=("parallel",),
                                  vmem_limit_bytes=vmem_limit)
    out_shape = jax.ShapeDtypeStruct((n_pad, f_out), out_dtype)
    if add is None:
        return pl.pallas_call(_linear_kernel, out_shape=out_shape, grid=grid,
                              in_specs=[x_spec, w_spec], out_specs=o_spec,
                              compiler_params=params)(x, w_t)
    add_spec = pl.BlockSpec((tile, f_out), lambda i: (i, 0))
    return pl.pallas_call(_linear_add_kernel, out_shape=out_shape, grid=grid,
                          in_specs=[add_spec, x_spec, w_spec], out_specs=o_spec,
                          compiler_params=params)(add, x, w_t)


def gcn_layer(a, x_agg, x_root, w_rel_t, w_root_t, b_rel, alpha, *,
              ti, tk, double_prelu, out_dtype, vmem_limit):
    n_pad = a.shape[0]
    f_in = x_root.shape[1]
    f_out = w_root_t.shape[1]
    f_agg = x_agg.shape[1]            # f_out when pre-projected, else f_in
    pre_projected = w_rel_t is None
    ni, nk = n_pad // ti, n_pad // tk

    kernel = functools.partial(_gcn_layer_kernel, pre_projected=pre_projected,
                               double_prelu=double_prelu)
    in_specs = [
        pl.BlockSpec((ti, tk), lambda i, k: (i, k)),       # A tile (dominant stream)
        pl.BlockSpec((tk, f_agg), lambda i, k: (k, 0)),    # aggregation input rows
        pl.BlockSpec((ti, f_in), lambda i, k: (i, 0)),     # root-term rows
    ]
    operands = [a, x_agg, x_root]
    if not pre_projected:
        in_specs.append(pl.BlockSpec((f_in, f_out), lambda i, k: (0, 0)))  # W_rel^T
        operands.append(w_rel_t)
    in_specs += [
        pl.BlockSpec((f_in, f_out), lambda i, k: (0, 0)),  # W_root^T
        pl.BlockSpec((1, f_out), lambda i, k: (0, 0)),     # b_rel
        pl.BlockSpec((1, f_out), lambda i, k: (0, 0)),     # PReLU alpha
    ]
    operands += [w_root_t, b_rel.reshape(1, -1), alpha.reshape(1, -1)]

    return pl.pallas_call(
        kernel,
        out_shape=jax.ShapeDtypeStruct((n_pad, f_out), out_dtype),
        grid=(ni, nk),
        in_specs=in_specs,
        out_specs=pl.BlockSpec((ti, f_out), lambda i, k: (i, 0)),
        scratch_shapes=[pltpu.VMEM((ti, f_agg), jnp.float32)],
        compiler_params=pltpu.CompilerParams(
            dimension_semantics=("parallel", "arbitrary"),
            vmem_limit_bytes=vmem_limit),
    )(*operands)


# ------------------------------ glue (plain JAX) ----------------------------

def build_mean_adj(edge_index, edge_weight, num_nodes, n_pad=None):
    """Dense row-normalized adjacency so that PyG mean aggregation == A @ x."""
    if n_pad is None:
        n_pad = num_nodes
    src, dst = edge_index[0], edge_index[1]
    if edge_weight is None:
        w = jnp.ones(src.shape, jnp.float32)
    else:
        w = edge_weight.astype(jnp.float32)
    a = jnp.zeros((num_nodes, num_nodes), jnp.float32).at[dst, src].add(w)
    deg = jnp.zeros((num_nodes,), jnp.float32).at[dst].add(1.0)
    deg = jnp.where(deg == 0.0, 1.0, deg)
    a = a / deg[:, None]
    return jnp.pad(a, ((0, n_pad - num_nodes), (0, n_pad - num_nodes)))


def init_params(key, input_size, hidden_size, embedding_size, num_layers=2):
    assert num_layers >= 2
    keys = jax.random.split(key, 3 * num_layers + 1)
    dims = ([(input_size, hidden_size)]
            + [(hidden_size, hidden_size)] * (num_layers - 2)
            + [(hidden_size, embedding_size)])
    convs = []
    for n, (din, dout) in enumerate(dims):
        scale = 1.0 / jnp.sqrt(jnp.float32(din))
        convs.append(dict(
            w_rel_t=(jax.random.normal(keys[3 * n], (din, dout)) * scale
                     ).astype(jnp.float32),
            b_rel=(jax.random.normal(keys[3 * n + 1], (dout,)) * scale
                   ).astype(jnp.float32),
            w_root_t=(jax.random.normal(keys[3 * n + 2], (din, dout)) * scale
                      ).astype(jnp.float32),
        ))
    # nn.ModuleList([Linear]*(num_layers-1)) shares ONE weight in PyTorch.
    skip_w_t = (jax.random.normal(keys[-1], (input_size, hidden_size))
                * (1.0 / jnp.sqrt(jnp.float32(input_size)))).astype(jnp.float32)
    # PReLU weights init 0.25; first (num_layers-1) activations are shared.
    alpha_hidden = jnp.full((hidden_size,), 0.25, jnp.float32)
    alpha_emb = jnp.full((embedding_size,), 0.25, jnp.float32)
    alphas = [alpha_hidden] * (num_layers - 1) + [alpha_emb]
    return dict(convs=convs, skip_w_t=skip_w_t, alphas=alphas)


def graphconv_encoder_forward(params, x, edge_index, edge_weight, *,
                              compute_dtype=jnp.bfloat16):
    num_layers = len(params["convs"])
    n, f_in = x.shape
    hidden = params["skip_w_t"].shape[1]
    emb = params["convs"][-1]["w_rel_t"].shape[1]

    two_tc, vmem_limit = _device_traits()
    n_pad, ti, tk = _plan_tiles(n, two_tc)
    f_in_p = _round_up(f_in, LANE)
    hid_p = _round_up(hidden, LANE)
    emb_p = _round_up(emb, LANE)

    def padf(a, rows, cols):
        return jnp.pad(a, ((0, rows - a.shape[0]), (0, cols - a.shape[1])))

    def padv(v, size):
        return jnp.pad(v, (0, size - v.shape[0]))

    # conv[0] is called without edge_weight in the PyTorch forward.
    a_u = build_mean_adj(edge_index, None, n, n_pad).astype(compute_dtype)
    a_w = build_mean_adj(edge_index, edge_weight, n, n_pad).astype(compute_dtype)

    x_p = padf(x, n_pad, f_in_p).astype(compute_dtype)

    dims_in = [f_in_p] + [hid_p] * (num_layers - 1)
    dims_out = [hid_p] * (num_layers - 1) + [emb_p]
    convs_p = []
    for l, c in enumerate(params["convs"]):
        convs_p.append(dict(
            w_rel_t=padf(c["w_rel_t"], dims_in[l], dims_out[l]).astype(compute_dtype),
            b_rel=padv(c["b_rel"], dims_out[l]).astype(jnp.float32),
            w_root_t=padf(c["w_root_t"], dims_in[l], dims_out[l]).astype(compute_dtype),
        ))
    alphas_p = [padv(a, d).astype(jnp.float32)
                for a, d in zip(params["alphas"], dims_out)]
    skip_w_p = padf(params["skip_w_t"], f_in_p, hid_p).astype(compute_dtype)

    def run_conv(a_norm, inp, conv, alpha, *, double_prelu, out_dtype):
        f_in_l = inp.shape[1]
        f_out_l = conv["w_rel_t"].shape[1]
        # NOTE: reassociation compares PADDED widths and changes rounding order vs
        # (A @ x) @ W_rel; covered by the asserted tolerances.
        if f_out_l < f_in_l:
            # Hoisted projection: m = inp @ W_rel computed ONCE (not once per row
            # block), and the N x N aggregation streams the narrower width f_out.
            x_agg = dense(inp, conv["w_rel_t"], tile=ti, out_dtype=compute_dtype,
                          vmem_limit=vmem_limit)
            w_rel = None
        else:
            x_agg = inp
            w_rel = conv["w_rel_t"]
        return gcn_layer(a_norm, x_agg, inp, w_rel, conv["w_root_t"],
                         conv["b_rel"], alpha, ti=ti, tk=tk,
                         double_prelu=double_prelu, out_dtype=out_dtype,
                         vmem_limit=vmem_limit)

    # Layer 0: conv + fused double PReLU -> seed of sum(h_l) (intermediate dtype).
    h_sum = run_conv(a_u, x_p, convs_p[0], alphas_p[0],
                     double_prelu=True, out_dtype=compute_dtype)

    h = None
    for l in range(1, num_layers):
        # Fused: inp = sum(h_l) + x @ W_skip   (one kernel, no extra HBM round trip).
        inp = dense(x_p, skip_w_p, add=h_sum, tile=ti,
                    out_dtype=compute_dtype, vmem_limit=vmem_limit)
        last = (l == num_layers - 1)
        h = run_conv(a_w, inp, convs_p[l], alphas_p[l], double_prelu=False,
                     out_dtype=jnp.float32 if last else compute_dtype)
        if not last:
            # Only hidden-width activations enter sum(h_l); the final embedding-width
            # h is returned, never accumulated.
            h_sum = h_sum + h
    return h[:n, :emb]


# ------------------------------ reference (pure JAX) -------------------------

def _ref_forward(params, x, edge_index, edge_weight):
    def prelu_ref(v, a):
        return jnp.where(v >= 0.0, v, a[None, :] * v)

    def conv_ref(a_norm, xin, c):
        return (a_norm @ xin) @ c["w_rel_t"] + c["b_rel"][None, :] + xin @ c["w_root_t"]

    n = x.shape[0]
    a_u = build_mean_adj(edge_index, None, n)
    a_w = build_mean_adj(edge_index, edge_weight, n)
    h = prelu_ref(conv_ref(a_u, x, params["convs"][0]), params["alphas"][0])
    h_l = [prelu_ref(h, params["alphas"][0])]
    for l in range(1, len(params["convs"])):
        x_skip = x @ params["skip_w_t"]
        h = prelu_ref(conv_ref(a_w, sum(h_l) + x_skip, params["convs"][l]),
                      params["alphas"][l])
        h_l.append(h)
    return h


# --------------------------------- main --------------------------------------

if __name__ == "__main__":
    N, E = 16, 48
    input_size, hidden_size, embedding_size = 8, 32, 16

    key = jax.random.PRNGKey(0)
    kx, ke_src, ke_dst, kw, kp = jax.random.split(key, 5)

    x = jax.random.normal(kx, (N, input_size), dtype=jnp.float32)
    edge_index = jnp.stack([
        jax.random.randint(ke_src, (E,), 0, N, dtype=jnp.int32),
        jax.random.randint(ke_dst, (E,), 0, N, dtype=jnp.int32),
    ], axis=0)
    edge_weight = jax.random.uniform(kw, (E,), dtype=jnp.float32)

    params = init_params(kp, input_size, hidden_size, embedding_size,
                         num_layers=2)

    fwd = jax.jit(graphconv_encoder_forward, static_argnames=("compute_dtype",))

    # f32 path: tight correctness check vs pure-JAX reference.
    out = jax.block_until_ready(
        fwd(params, x, edge_index, edge_weight, compute_dtype=jnp.float32))
    ref = jax.block_until_ready(_ref_forward(params, x, edge_index, edge_weight))
    assert out.shape == (N, embedding_size)
    assert jnp.allclose(out, ref, rtol=1e-3, atol=1e-3), "mismatch vs JAX reference"

    # Default bf16 MXU-input path (production setting), f32 accumulation.
    out_bf16 = jax.block_until_ready(fwd(params, x, edge_index, edge_weight))
    assert out_bf16.shape == (N, embedding_size)
    assert jnp.allclose(out_bf16, ref, rtol=1e-1, atol=1e-1), "bf16 path diverged"

    print("KERNEL_OK")
</pallas_src>

<mosaic_0001>
module attributes {stable_mosaic.version = 11 : i64} {
  func.func private @main(%arg0: i32) attributes {dimension_semantics = [#tpu.dimension_semantics<core_parallel>], iteration_bounds = array<i64: 2>, tpu.core_type = #tpu.core_type<sc_scalar_subcore>, window_params = []} {
    return
  }
}

module attributes {stable_mosaic.version = 11 : i64} {
  func.func private @main(%arg0: i32) attributes {dimension_semantics = [#tpu.dimension_semantics<core_parallel>], iteration_bounds = array<i64: 2>, tpu.core_type = #tpu.core_type<sc_scalar_subcore>, window_params = []} {
    return
  }
}

module attributes {stable_mosaic.version = 11 : i64} {
  func.func @_gcn_layer_kernel(%arg0: i32, %arg1: i32, %arg2: memref<128x128xf32, #tpu.memory_space<vmem>>, %arg3: memref<128x128xf32, #tpu.memory_space<vmem>>, %arg4: memref<128x128xf32, #tpu.memory_space<vmem>>, %arg5: memref<128x128xf32, #tpu.memory_space<vmem>>, %arg6: memref<128x128xf32, #tpu.memory_space<vmem>>, %arg7: memref<1x128xf32, #tpu.memory_space<vmem>>, %arg8: memref<1x128xf32, #tpu.memory_space<vmem>>, %arg9: memref<128x128xf32, #tpu.memory_space<vmem>>, %arg10: memref<128x128xf32, #tpu.memory_space<vmem>>) attributes {dimension_semantics = [#tpu.dimension_semantics<parallel>, #tpu.dimension_semantics<arbitrary>], iteration_bounds = array<i64: 1, 1>, scalar_prefetch = 0 : i64, scratch_operands = 1 : i64, tpu.core_type = #tpu.core_type<tc>, window_params = [{transform_indices = @transform_0, window_bounds = array<i64: 128, 128>}, {transform_indices = @transform_1, window_bounds = array<i64: 128, 128>}, {transform_indices = @transform_2, window_bounds = array<i64: 128, 128>}, {pipeline_mode = #tpu.pipeline_mode<synchronous>, transform_indices = @transform_3, window_bounds = array<i64: 128, 128>}, {pipeline_mode = #tpu.pipeline_mode<synchronous>, transform_indices = @transform_4, window_bounds = array<i64: 128, 128>}, {pipeline_mode = #tpu.pipeline_mode<synchronous>, transform_indices = @transform_5, window_bounds = array<i64: 1, 128>}, {pipeline_mode = #tpu.pipeline_mode<synchronous>, transform_indices = @transform_6, window_bounds = array<i64: 1, 128>}, {transform_indices = @transform_7, window_bounds = array<i64: 128, 128>}]} {
    %c0_i32 = arith.constant 0 : i32
    %0 = arith.cmpi eq, %arg1, %c0_i32 : i32
    %1 = arith.extui %0 : i1 to i32
    %c0_i32_0 = arith.constant 0 : i32
    %2 = arith.cmpi ne, %1, %c0_i32_0 : i32
    scf.if %2 {
      %cst_10 = arith.constant 0.000000e+00 : f32
      %12 = vector.broadcast %cst_10 : f32 to vector<128x128xf32>
      %c0_11 = arith.constant 0 : index
      %c0_12 = arith.constant 0 : index
      %13 = vector.load %arg10[%c0_11, %c0_12] : memref<128x128xf32, #tpu.memory_space<vmem>>, vector<128x128xf32>
      tpu.vector_store %arg10[%c0_11, %c0_12], %12 {strides = array<i32>} : memref<128x128xf32, #tpu.memory_space<vmem>>, vector<128x128xf32>,
    } else {
    }
    %c0 = arith.constant 0 : index
    %c0_1 = arith.constant 0 : index
    %3 = vector.load %arg10[%c0, %c0_1] : memref<128x128xf32, #tpu.memory_space<vmem>>, vector<128x128xf32>
    %c0_2 = arith.constant 0 : index
    %c0_3 = arith.constant 0 : index
    %4 = vector.load %arg2[%c0_2, %c0_3] : memref<128x128xf32, #tpu.memory_space<vmem>>, vector<128x128xf32>
    %c0_4 = arith.constant 0 : index
    %c0_5 = arith.constant 0 : index
    %5 = vector.load %arg3[%c0_4, %c0_5] : memref<128x128xf32, #tpu.memory_space<vmem>>, vector<128x128xf32>
    %cst = arith.constant dense<0.000000e+00> : vector<128x128xf32>
    %6 = tpu.matmul %4, %5, %cst {dimension_numbers = #tpu.dot_dimension_numbers<[1], [0], [0], [1], [0, 0, 1, 1], [], []>} : vector<128x128xf32>, vector<128x128xf32>, vector<128x128xf32> -> vector<128x128xf32>
    %7 = arith.addf %3, %6 : vector<128x128xf32>
    %c0_6 = arith.constant 0 : index
    %c0_7 = arith.constant 0 : index
    %8 = vector.load %arg10[%c0_6, %c0_7] : memref<128x128xf32, #tpu.memory_space<vmem>>, vector<128x128xf32>
    tpu.vector_store %arg10[%c0_6, %c0_7], %7 {strides = array<i32>} : memref<128x128xf32, #tpu.memory_space<vmem>>, vector<128x128xf32>,
    %c0_i32_8 = arith.constant 0 : i32
    %9 = arith.cmpi eq, %arg1, %c0_i32_8 : i32
    %10 = arith.extui %9 : i1 to i32
    %c0_i32_9 = arith.constant 0 : i32
    %11 = arith.cmpi ne, %10, %c0_i32_9 : i32
    scf.if %11 {
      %c0_10 = arith.constant 0 : index
      %c0_11 = arith.constant 0 : index
      %12 = vector.load %arg10[%c0_10, %c0_11] : memref<128x128xf32, #tpu.memory_space<vmem>>, vector<128x128xf32>
      %c0_12 = arith.constant 0 : index
      %c0_13 = arith.constant 0 : index
      %13 = vector.load %arg5[%c0_12, %c0_13] : memref<128x128xf32, #tpu.memory_space<vmem>>, vector<128x128xf32>
      %cst_14 = arith.constant dense<0.000000e+00> : vector<128x128xf32>
      %14 = tpu.matmul %12, %13, %cst_14 {dimension_numbers = #tpu.dot_dimension_numbers<[1], [0], [0], [1], [0, 0, 1, 1], [], []>} : vector<128x128xf32>, vector<128x128xf32>, vector<128x128xf32> -> vector<128x128xf32>
      %c0_15 = arith.constant 0 : index
      %c0_16 = arith.constant 0 : index
      %15 = vector.load %arg7[%c0_15, %c0_16] : memref<1x128xf32, #tpu.memory_space<vmem>>, vector<1x128xf32>
      %16 = vector.broadcast %15 : vector<1x128xf32> to vector<128x128xf32>
      %17 = arith.addf %14, %16 : vector<128x128xf32>
      %c0_17 = arith.constant 0 : index
      %c0_18 = arith.constant 0 : index
      %18 = vector.load %arg4[%c0_17, %c0_18] : memref<128x128xf32, #tpu.memory_space<vmem>>, vector<128x128xf32>
      %c0_19 = arith.constant 0 : index
      %c0_20 = arith.constant 0 : index
      %19 = vector.load %arg6[%c0_19, %c0_20] : memref<128x128xf32, #tpu.memory_space<vmem>>, vector<128x128xf32>
      %cst_21 = arith.constant dense<0.000000e+00> : vector<128x128xf32>
      %20 = tpu.matmul %18, %19, %cst_21 {dimension_numbers = #tpu.dot_dimension_numbers<[1], [0], [0], [1], [0, 0, 1, 1], [], []>} : vector<128x128xf32>, vector<128x128xf32>, vector<128x128xf32> -> vector<128x128xf32>
      %21 = arith.addf %17, %20 : vector<128x128xf32>
      %c0_22 = arith.constant 0 : index
      %c0_23 = arith.constant 0 : index
      %22 = vector.load %arg8[%c0_22, %c0_23] : memref<1x128xf32, #tpu.memory_space<vmem>>, vector<1x128xf32>
      %cst_24 = arith.constant 0.000000e+00 : f32
      %23 = vector.broadcast %cst_24 : f32 to vector<128x128xf32>
      %24 = arith.cmpf oge, %21, %23 : vector<128x128xf32>
      %25 = vector.broadcast %22 : vector<1x128xf32> to vector<128x128xf32>
      %26 = arith.mulf %25, %21 : vector<128x128xf32>
      %27 = arith.select %24, %21, %26 : vector<128x128xi1>, vector<128x128xf32>
      %c0_25 = arith.constant 0 : index
      %c0_26 = arith.constant 0 : index
      %28 = vector.load %arg9[%c0_25, %c0_26] : memref<128x128xf32, #tpu.memory_space<vmem>>, vector<128x128xf32>
      tpu.vector_store %arg9[%c0_25, %c0_26], %27 {strides = array<i32>} : memref<128x128xf32, #tpu.memory_space<vmem>>, vector<128x128xf32>,
    } else {
    }
    return
  }
  func.func @transform_0(%arg0: i32, %arg1: i32) -> (i32, i32) {
    %c0_i32 = arith.constant 0 : i32
    return %arg0, %arg1 : i32, i32
  }
  func.func @transform_1(%arg0: i32, %arg1: i32) -> (i32, i32) {
    %c0_i32 = arith.constant 0 : i32
    %c0_i32_0 = arith.constant 0 : i32
    return %arg1, %c0_i32 : i32, i32
  }
  func.func @transform_2(%arg0: i32, %arg1: i32) -> (i32, i32) {
    %c0_i32 = arith.constant 0 : i32
    %c0_i32_0 = arith.constant 0 : i32
    return %arg0, %c0_i32 : i32, i32
  }
  func.func @transform_3(%arg0: i32, %arg1: i32) -> (i32, i32) {
    %c0_i32 = arith.constant 0 : i32
    %c0_i32_0 = arith.constant 0 : i32
    %c0_i32_1 = arith.constant 0 : i32
    return %c0_i32, %c0_i32_0 : i32, i32
  }
  func.func @transform_4(%arg0: i32, %arg1: i32) -> (i32, i32) {
    %c0_i32 = arith.constant 0 : i32
    %c0_i32_0 = arith.constant 0 : i32
    %c0_i32_1 = arith.constant 0 : i32
    return %c0_i32, %c0_i32_0 : i32, i32
  }
  func.func @transform_5(%arg0: i32, %arg1: i32) -> (i32, i32) {
    %c0_i32 = arith.constant 0 : i32
    %c0_i32_0 = arith.constant 0 : i32
    %c0_i32_1 = arith.constant 0 : i32
    return %c0_i32, %c0_i32_0 : i32, i32
  }
  func.func @transform_6(%arg0: i32, %arg1: i32) -> (i32, i32) {
    %c0_i32 = arith.constant 0 : i32
    %c0_i32_0 = arith.constant 0 : i32
    %c0_i32_1 = arith.constant 0 : i32
    return %c0_i32, %c0_i32_0 : i32, i32
  }
  func.func @transform_7(%arg0: i32, %arg1: i32) -> (i32, i32) {
    %c0_i32 = arith.constant 0 : i32
    %c0_i32_0 = arith.constant 0 : i32
    return %arg0, %c0_i32 : i32, i32
  }
}

module attributes {stable_mosaic.version = 11 : i64} {
  func.func @_linear_add_kernel(%arg0: i32, %arg1: memref<128x128xf32, #tpu.memory_space<vmem>>, %arg2: memref<128x128xf32, #tpu.memory_space<vmem>>, %arg3: memref<128x128xf32, #tpu.memory_space<vmem>>, %arg4: memref<128x128xf32, #tpu.memory_space<vmem>>) attributes {dimension_semantics = [#tpu.dimension_semantics<parallel>], iteration_bounds = array<i64: 1>, scalar_prefetch = 0 : i64, scratch_operands = 0 : i64, tpu.core_type = #tpu.core_type<tc>, window_params = [{transform_indices = @transform_0, window_bounds = array<i64: 128, 128>}, {transform_indices = @transform_1, window_bounds = array<i64: 128, 128>}, {pipeline_mode = #tpu.pipeline_mode<synchronous>, transform_indices = @transform_2, window_bounds = array<i64: 128, 128>}, {transform_indices = @transform_3, window_bounds = array<i64: 128, 128>}]} {
    %c0 = arith.constant 0 : index
    %c0_0 = arith.constant 0 : index
    %0 = vector.load %arg1[%c0, %c0_0] : memref<128x128xf32, #tpu.memory_space<vmem>>, vector<128x128xf32>
    %c0_1 = arith.constant 0 : index
    %c0_2 = arith.constant 0 : index
    %1 = vector.load %arg2[%c0_1, %c0_2] : memref<128x128xf32, #tpu.memory_space<vmem>>, vector<128x128xf32>
    %c0_3 = arith.constant 0 : index
    %c0_4 = arith.constant 0 : index
    %2 = vector.load %arg3[%c0_3, %c0_4] : memref<128x128xf32, #tpu.memory_space<vmem>>, vector<128x128xf32>
    %cst = arith.constant dense<0.000000e+00> : vector<128x128xf32>
    %3 = tpu.matmul %1, %2, %cst {dimension_numbers = #tpu.dot_dimension_numbers<[1], [0], [0], [1], [0, 0, 1, 1], [], []>} : vector<128x128xf32>, vector<128x128xf32>, vector<128x128xf32> -> vector<128x128xf32>
    %4 = arith.addf %0, %3 : vector<128x128xf32>
    %c0_5 = arith.constant 0 : index
    %c0_6 = arith.constant 0 : index
    %5 = vector.load %arg4[%c0_5, %c0_6] : memref<128x128xf32, #tpu.memory_space<vmem>>, vector<128x128xf32>
    tpu.vector_store %arg4[%c0_5, %c0_6], %4 {strides = array<i32>} : memref<128x128xf32, #tpu.memory_space<vmem>>, vector<128x128xf32>,
    return
  }
  func.func @transform_0(%arg0: i32) -> (i32, i32) {
    %c0_i32 = arith.constant 0 : i32
    %c0_i32_0 = arith.constant 0 : i32
    return %arg0, %c0_i32 : i32, i32
  }
  func.func @transform_1(%arg0: i32) -> (i32, i32) {
    %c0_i32 = arith.constant 0 : i32
    %c0_i32_0 = arith.constant 0 : i32
    return %arg0, %c0_i32 : i32, i32
  }
  func.func @transform_2(%arg0: i32) -> (i32, i32) {
    %c0_i32 = arith.constant 0 : i32
    %c0_i32_0 = arith.constant 0 : i32
    %c0_i32_1 = arith.constant 0 : i32
    return %c0_i32, %c0_i32_0 : i32, i32
  }
  func.func @transform_3(%arg0: i32) -> (i32, i32) {
    %c0_i32 = arith.constant 0 : i32
    %c0_i32_0 = arith.constant 0 : i32
    return %arg0, %c0_i32 : i32, i32
  }
}

module attributes {stable_mosaic.version = 11 : i64} {
  func.func @_gcn_layer_kernel(%arg0: i32, %arg1: i32, %arg2: memref<128x128xf32, #tpu.memory_space<vmem>>, %arg3: memref<128x128xf32, #tpu.memory_space<vmem>>, %arg4: memref<128x128xf32, #tpu.memory_space<vmem>>, %arg5: memref<128x128xf32, #tpu.memory_space<vmem>>, %arg6: memref<128x128xf32, #tpu.memory_space<vmem>>, %arg7: memref<1x128xf32, #tpu.memory_space<vmem>>, %arg8: memref<1x128xf32, #tpu.memory_space<vmem>>, %arg9: memref<128x128xf32, #tpu.memory_space<vmem>>, %arg10: memref<128x128xf32, #tpu.memory_space<vmem>>) attributes {dimension_semantics = [#tpu.dimension_semantics<parallel>, #tpu.dimension_semantics<arbitrary>], iteration_bounds = array<i64: 1, 1>, scalar_prefetch = 0 : i64, scratch_operands = 1 : i64, tpu.core_type = #tpu.core_type<tc>, window_params = [{transform_indices = @transform_0, window_bounds = array<i64: 128, 128>}, {transform_indices = @transform_1, window_bounds = array<i64: 128, 128>}, {transform_indices = @transform_2, window_bounds = array<i64: 128, 128>}, {pipeline_mode = #tpu.pipeline_mode<synchronous>, transform_indices = @transform_3, window_bounds = array<i64: 128, 128>}, {pipeline_mode = #tpu.pipeline_mode<synchronous>, transform_indices = @transform_4, window_bounds = array<i64: 128, 128>}, {pipeline_mode = #tpu.pipeline_mode<synchronous>, transform_indices = @transform_5, window_bounds = array<i64: 1, 128>}, {pipeline_mode = #tpu.pipeline_mode<synchronous>, transform_indices = @transform_6, window_bounds = array<i64: 1, 128>}, {transform_indices = @transform_7, window_bounds = array<i64: 128, 128>}]} {
    %c0_i32 = arith.constant 0 : i32
    %0 = arith.cmpi eq, %arg1, %c0_i32 : i32
    %1 = arith.extui %0 : i1 to i32
    %c0_i32_0 = arith.constant 0 : i32
    %2 = arith.cmpi ne, %1, %c0_i32_0 : i32
    scf.if %2 {
      %cst_10 = arith.constant 0.000000e+00 : f32
      %12 = vector.broadcast %cst_10 : f32 to vector<128x128xf32>
      %c0_11 = arith.constant 0 : index
      %c0_12 = arith.constant 0 : index
      %13 = vector.load %arg10[%c0_11, %c0_12] : memref<128x128xf32, #tpu.memory_space<vmem>>, vector<128x128xf32>
      tpu.vector_store %arg10[%c0_11, %c0_12], %12 {strides = array<i32>} : memref<128x128xf32, #tpu.memory_space<vmem>>, vector<128x128xf32>,
    } else {
    }
    %c0 = arith.constant 0 : index
    %c0_1 = arith.constant 0 : index
    %3 = vector.load %arg10[%c0, %c0_1] : memref<128x128xf32, #tpu.memory_space<vmem>>, vector<128x128xf32>
    %c0_2 = arith.constant 0 : index
    %c0_3 = arith.constant 0 : index
    %4 = vector.load %arg2[%c0_2, %c0_3] : memref<128x128xf32, #tpu.memory_space<vmem>>, vector<128x128xf32>
    %c0_4 = arith.constant 0 : index
    %c0_5 = arith.constant 0 : index
    %5 = vector.load %arg3[%c0_4, %c0_5] : memref<128x128xf32, #tpu.memory_space<vmem>>, vector<128x128xf32>
    %cst = arith.constant dense<0.000000e+00> : vector<128x128xf32>
    %6 = tpu.matmul %4, %5, %cst {dimension_numbers = #tpu.dot_dimension_numbers<[1], [0], [0], [1], [0, 0, 1, 1], [], []>} : vector<128x128xf32>, vector<128x128xf32>, vector<128x128xf32> -> vector<128x128xf32>
    %7 = arith.addf %3, %6 : vector<128x128xf32>
    %c0_6 = arith.constant 0 : index
    %c0_7 = arith.constant 0 : index
    %8 = vector.load %arg10[%c0_6, %c0_7] : memref<128x128xf32, #tpu.memory_space<vmem>>, vector<128x128xf32>
    tpu.vector_store %arg10[%c0_6, %c0_7], %7 {strides = array<i32>} : memref<128x128xf32, #tpu.memory_space<vmem>>, vector<128x128xf32>,
    %c0_i32_8 = arith.constant 0 : i32
    %9 = arith.cmpi eq, %arg1, %c0_i32_8 : i32
    %10 = arith.extui %9 : i1 to i32
    %c0_i32_9 = arith.constant 0 : i32
    %11 = arith.cmpi ne, %10, %c0_i32_9 : i32
    scf.if %11 {
      %c0_10 = arith.constant 0 : index
      %c0_11 = arith.constant 0 : index
      %12 = vector.load %arg10[%c0_10, %c0_11] : memref<128x128xf32, #tpu.memory_space<vmem>>, vector<128x128xf32>
      %c0_12 = arith.constant 0 : index
      %c0_13 = arith.constant 0 : index
      %13 = vector.load %arg5[%c0_12, %c0_13] : memref<128x128xf32, #tpu.memory_space<vmem>>, vector<128x128xf32>
      %cst_14 = arith.constant dense<0.000000e+00> : vector<128x128xf32>
      %14 = tpu.matmul %12, %13, %cst_14 {dimension_numbers = #tpu.dot_dimension_numbers<[1], [0], [0], [1], [0, 0, 1, 1], [], []>} : vector<128x128xf32>, vector<128x128xf32>, vector<128x128xf32> -> vector<128x128xf32>
      %c0_15 = arith.constant 0 : index
      %c0_16 = arith.constant 0 : index
      %15 = vector.load %arg7[%c0_15, %c0_16] : memref<1x128xf32, #tpu.memory_space<vmem>>, vector<1x128xf32>
      %16 = vector.broadcast %15 : vector<1x128xf32> to vector<128x128xf32>
      %17 = arith.addf %14, %16 : vector<128x128xf32>
      %c0_17 = arith.constant 0 : index
      %c0_18 = arith.constant 0 : index
      %18 = vector.load %arg4[%c0_17, %c0_18] : memref<128x128xf32, #tpu.memory_space<vmem>>, vector<128x128xf32>
      %c0_19 = arith.constant 0 : index
      %c0_20 = arith.constant 0 : index
      %19 = vector.load %arg6[%c0_19, %c0_20] : memref<128x128xf32, #tpu.memory_space<vmem>>, vector<128x128xf32>
      %cst_21 = arith.constant dense<0.000000e+00> : vector<128x128xf32>
      %20 = tpu.matmul %18, %19, %cst_21 {dimension_numbers = #tpu.dot_dimension_numbers<[1], [0], [0], [1], [0, 0, 1, 1], [], []>} : vector<128x128xf32>, vector<128x128xf32>, vector<128x128xf32> -> vector<128x128xf32>
      %21 = arith.addf %17, %20 : vector<128x128xf32>
      %c0_22 = arith.constant 0 : index
      %c0_23 = arith.constant 0 : index
      %22 = vector.load %arg8[%c0_22, %c0_23] : memref<1x128xf32, #tpu.memory_space<vmem>>, vector<1x128xf32>
      %cst_24 = arith.constant 0.000000e+00 : f32
      %23 = vector.broadcast %cst_24 : f32 to vector<128x128xf32>
      %24 = arith.cmpf oge, %21, %23 : vector<128x128xf32>
      %25 = vector.broadcast %22 : vector<1x128xf32> to vector<128x128xf32>
      %26 = arith.mulf %25, %21 : vector<128x128xf32>
      %27 = arith.select %24, %21, %26 : vector<128x128xi1>, vector<128x128xf32>
      %cst_25 = arith.constant 0.000000e+00 : f32
      %28 = vector.broadcast %cst_25 : f32 to vector<128x128xf32>
      %29 = arith.cmpf oge, %27, %28 : vector<128x128xf32>
      %30 = vector.broadcast %22 : vector<1x128xf32> to vector<128x128xf32>
      %31 = arith.mulf %30, %27 : vector<128x128xf32>
      %32 = arith.select %29, %27, %31 : vector<128x128xi1>, vector<128x128xf32>
      %c0_26 = arith.constant 0 : index
      %c0_27 = arith.constant 0 : index
      %33 = vector.load %arg9[%c0_26, %c0_27] : memref<128x128xf32, #tpu.memory_space<vmem>>, vector<128x128xf32>
      tpu.vector_store %arg9[%c0_26, %c0_27], %32 {strides = array<i32>} : memref<128x128xf32, #tpu.memory_space<vmem>>, vector<128x128xf32>,
    } else {
    }
    return
  }
  func.func @transform_0(%arg0: i32, %arg1: i32) -> (i32, i32) {
    %c0_i32 = arith.constant 0 : i32
    return %arg0, %arg1 : i32, i32
  }
  func.func @transform_1(%arg0: i32, %arg1: i32) -> (i32, i32) {
    %c0_i32 = arith.constant 0 : i32
    %c0_i32_0 = arith.constant 0 : i32
    return %arg1, %c0_i32 : i32, i32
  }
  func.func @transform_2(%arg0: i32, %arg1: i32) -> (i32, i32) {
    %c0_i32 = arith.constant 0 : i32
    %c0_i32_0 = arith.constant 0 : i32
    return %arg0, %c0_i32 : i32, i32
  }
  func.func @transform_3(%arg0: i32, %arg1: i32) -> (i32, i32) {
    %c0_i32 = arith.constant 0 : i32
    %c0_i32_0 = arith.constant 0 : i32
    %c0_i32_1 = arith.constant 0 : i32
    return %c0_i32, %c0_i32_0 : i32, i32
  }
  func.func @transform_4(%arg0: i32, %arg1: i32) -> (i32, i32) {
    %c0_i32 = arith.constant 0 : i32
    %c0_i32_0 = arith.constant 0 : i32
    %c0_i32_1 = arith.constant 0 : i32
    return %c0_i32, %c0_i32_0 : i32, i32
  }
  func.func @transform_5(%arg0: i32, %arg1: i32) -> (i32, i32) {
    %c0_i32 = arith.constant 0 : i32
    %c0_i32_0 = arith.constant 0 : i32
    %c0_i32_1 = arith.constant 0 : i32
    return %c0_i32, %c0_i32_0 : i32, i32
  }
  func.func @transform_6(%arg0: i32, %arg1: i32) -> (i32, i32) {
    %c0_i32 = arith.constant 0 : i32
    %c0_i32_0 = arith.constant 0 : i32
    %c0_i32_1 = arith.constant 0 : i32
    return %c0_i32, %c0_i32_0 : i32, i32
  }
  func.func @transform_7(%arg0: i32, %arg1: i32) -> (i32, i32) {
    %c0_i32 = arith.constant 0 : i32
    %c0_i32_0 = arith.constant 0 : i32
    return %arg0, %c0_i32 : i32, i32
  }
}

</mosaic_0001>

<bundles_post_ra>
// kernel: graphconv_encoder_forward.4
= control target key start
LH: loop header
LB: loop body
LE: loop exit
PB: predicated region body
PF: predicated region fallthrough
CT: control target
= control target key end

     0   :  { %s575_s2 = inlined_call_operand.vmem [shape: f32[128,128], index: 2, kind: input, shape index: {}]   ;;  %s576_s1 = inlined_call_operand.vmem [shape: f32[128,128], index: 1, kind: input, shape index: {}]   ;;  %s577_s0 = inlined_call_operand.vmem [shape: f32[128,128], index: 0, kind: input, shape index: {}]   ;;  %s578_s3 = inlined_call_operand.vmem [shape: f32[128,128], index: 3, kind: output, shape index: {}]  }
   0x1   :  { %v61_v0 = vld [vmem:[%s575_s2 + $0x78] sm:$0xff]  ;;  %v60_v1 = vld [vmem:[%s575_s2 + $0x70] sm:$0xff]  ;;  %v59_v2 = vld [vmem:[%s575_s2 + $0x68] sm:$0xff] }
   0x2   :  { %275 = vmatprep.subr.mxu0 %v61_v0  ;;  %331 = vmatprep.subr.mxu1 %v61_v0  ;;  %v58_v3 = vld [vmem:[%s575_s2 + $0x60] sm:$0xff]  ;;  %v57_v4 = vld [vmem:[%s575_s2 + $0x58] sm:$0xff]  ;;  %v56_v5 = vld [vmem:[%s575_s2 + $0x50] sm:$0xff] }
   0x3   :  { %276 = vmatpush3.msra.mxu0 %v61_v0  ;;  %347 = vmatpush3.msra.mxu1 %v61_v0  ;;  %v55_v6 = vld [vmem:[%s575_s2 + $0x48] sm:$0xff]  ;;  %v54_v7 = vld [vmem:[%s575_s2 + $0x40] sm:$0xff]  ;;  %v53_v8 = vld [vmem:[%s575_s2 + $0x38] sm:$0xff] }
   0x4   :  { %277 = vmatprep.subr.mxu0 %v60_v1  ;;  %332 = vmatprep.subr.mxu1 %v60_v1  ;;  %v52_v9 = vld [vmem:[%s575_s2 + $0x30] sm:$0xff]  ;;  %v51_v10 = vld [vmem:[%s575_s2 + $0x28] sm:$0xff]  ;;  %v50_v11 = vld [vmem:[%s575_s2 + $0x20] sm:$0xff] }
   0x5   :  { %278 = vmatpush3.msra.mxu0 %v60_v1  ;;  %348 = vmatpush3.msra.mxu1 %v60_v1  ;;  %v49_v12 = vld [vmem:[%s575_s2 + $0x18] sm:$0xff]  ;;  %v48_v13 = vld [vmem:[%s575_s2 + $0x10] sm:$0xff]  ;;  %v47_v14 = vld [vmem:[%s575_s2 + $0x8] sm:$0xff] }
   0x6   :  { %279 = vmatprep.subr.mxu0 %v59_v2  ;;  %333 = vmatprep.subr.mxu1 %v59_v2  ;;  %v46_v15 = vld [vmem:[%s575_s2] sm:$0xff]  ;;  %v31_v18 = vld [vmem:[%s576_s1 + $0x8] sm:$0xff]  ;;  %v32_v20 = vld [vmem:[%s576_s1 + $0x10] sm:$0xff] }
   0x7   :  { %280 = vmatpush3.msra.mxu0 %v59_v2  ;;  %349 = vmatpush3.msra.mxu1 %v59_v2  ;;  %v30_v16 = vld [vmem:[%s576_s1] sm:$0xff]  ;;  %v39_v19 = vld [vmem:[%s576_s1 + $0x48] sm:$0xff]  ;;  %v40_v21 = vld [vmem:[%s576_s1 + $0x50] sm:$0xff] }
   0x8   :  { %281 = vmatprep.subr.mxu0 %v58_v3  ;;  %334 = vmatprep.subr.mxu1 %v58_v3  ;;  %v38_v17 = vld [vmem:[%s576_s1 + $0x40] sm:$0xff]  ;;  %v33_v22 = vld [vmem:[%s576_s1 + $0x18] sm:$0xff]  ;;  %v35_v26 = vld [vmem:[%s576_s1 + $0x28] sm:$0xff] }
   0x9   :  { %282 = vmatpush3.msra.mxu0 %v58_v3  ;;  %350 = vmatpush3.msra.mxu1 %v58_v3  ;;  %v41_v23 = vld [vmem:[%s576_s1 + $0x58] sm:$0xff]  ;;  %v34_v24 = vld [vmem:[%s576_s1 + $0x20] sm:$0xff]  ;;  %v43_v27 = vld [vmem:[%s576_s1 + $0x68] sm:$0xff] }
   0xa   :  { %283 = vmatprep.subr.mxu0 %v57_v4  ;;  %335 = vmatprep.subr.mxu1 %v57_v4  ;;  %v42_v25 = vld [vmem:[%s576_s1 + $0x60] sm:$0xff]  ;;  %v36_v28 = vld [vmem:[%s576_s1 + $0x30] sm:$0xff]  ;;  %v37_v30 = vld [vmem:[%s576_s1 + $0x38] sm:$0xff] }
   0xb   :  { %284 = vmatpush3.msra.mxu0 %v57_v4  ;;  %351 = vmatpush3.msra.mxu1 %v57_v4  ;;  %v44_v29 = vld [vmem:[%s576_s1 + $0x70] sm:$0xff]  ;;  %v45_v31 = vld [vmem:[%s576_s1 + $0x78] sm:$0xff]  ;;  %v15_v32 = vld [vmem:[%s577_s0 + $0x8] sm:$0xff] }
   0xc   :  { %285 = vmatprep.subr.mxu0 %v56_v5  ;;  %336 = vmatprep.subr.mxu1 %v56_v5  ;;  %v23_v33 = vld [vmem:[%s577_s0 + $0x48] sm:$0xff]  ;;  %v14_v36 = vld [vmem:[%s577_s0] sm:$0xff]  ;;  %v17_v42 = vld [vmem:[%s577_s0 + $0x18] sm:$0xff] }
   0xd   :  { %286 = vmatpush3.msra.mxu0 %v56_v5  ;;  %352 = vmatpush3.msra.mxu1 %v56_v5  ;;  %v22_v37 = vld [vmem:[%s577_s0 + $0x40] sm:$0xff]  ;;  %v25_v43 = vld [vmem:[%s577_s0 + $0x58] sm:$0xff]  ;;  %v16_v48 = vld [vmem:[%s577_s0 + $0x10] sm:$0xff] }
   0xe   :  { %287 = vmatprep.subr.mxu0 %v55_v6  ;;  %337 = vmatprep.subr.mxu1 %v55_v6  ;;  %v24_v49 = vld [vmem:[%s577_s0 + $0x50] sm:$0xff]  ;;  %v19_v54 = vld [vmem:[%s577_s0 + $0x28] sm:$0xff]  ;;  %v18_v60 = vld [vmem:[%s577_s0 + $0x20] sm:$0xff] }
   0xf   :  { %288 = vmatpush3.msra.mxu0 %v55_v6  ;;  %353 = vmatpush3.msra.mxu1 %v55_v6  ;;  %v27_v55 = vld [vmem:[%s577_s0 + $0x68] sm:$0xff]  ;;  %v26_v61 = vld [vmem:[%s577_s0 + $0x60] sm:$0xff]  ;;  %v21_v2 = vld [vmem:[%s577_s0 + $0x38] sm:$0xff] }
  0x10   :  { %289 = vmatprep.subr.mxu0 %v54_v7  ;;  %338 = vmatprep.subr.mxu1 %v54_v7  ;;  %v29_v3 = vld [vmem:[%s577_s0 + $0x78] sm:$0xff] }
  0x11   :  { %290 = vmatpush3.msra.mxu0 %v54_v7  ;;  %354 = vmatpush3.msra.mxu1 %v54_v7 }
  0x12   :  { %291 = vmatprep.subr.mxu0 %v53_v8  ;;  %339 = vmatprep.subr.mxu1 %v53_v8 }
  0x13   :  { %292 = vmatpush3.msra.mxu0 %v53_v8  ;;  %355 = vmatpush3.msra.mxu1 %v53_v8  ;;  %v20_v8 = vld [vmem:[%s577_s0 + $0x30] sm:$0xff] }
  0x14   :  { %293 = vmatprep.subr.mxu0 %v52_v9  ;;  %340 = vmatprep.subr.mxu1 %v52_v9 }
  0x15   :  { %294 = vmatpush3.msra.mxu0 %v52_v9  ;;  %356 = vmatpush3.msra.mxu1 %v52_v9  ;;  %v28_v9 = vld [vmem:[%s577_s0 + $0x70] sm:$0xff] }
  0x16   :  { %295 = vmatprep.subr.mxu0 %v51_v10  ;;  %341 = vmatprep.subr.mxu1 %v51_v10 }
  0x17   :  { %296 = vmatpush3.msra.mxu0 %v51_v10  ;;  %357 = vmatpush3.msra.mxu1 %v51_v10 }
  0x18   :  { %297 = vmatprep.subr.mxu0 %v50_v11  ;;  %342 = vmatprep.subr.mxu1 %v50_v11 }
  0x19   :  { %298 = vmatpush3.msra.mxu0 %v50_v11  ;;  %358 = vmatpush3.msra.mxu1 %v50_v11 }
  0x1a   :  { %299 = vmatprep.subr.mxu0 %v49_v12  ;;  %343 = vmatprep.subr.mxu1 %v49_v12 }
  0x1b   :  { %300 = vmatpush3.msra.mxu0 %v49_v12  ;;  %359 = vmatpush3.msra.mxu1 %v49_v12 }
  0x1c   :  { %301 = vmatprep.subr.mxu0 %v48_v13  ;;  %344 = vmatprep.subr.mxu1 %v48_v13 }
  0x1d   :  { %302 = vmatpush3.msra.mxu0 %v48_v13  ;;  %360 = vmatpush3.msra.mxu1 %v48_v13 }
  0x1e   :  { %303 = vmatprep.subr.mxu0 %v47_v14  ;;  %345 = vmatprep.subr.mxu1 %v47_v14 }
  0x1f   :  { %304 = vmatpush3.msra.mxu0 %v47_v14  ;;  %361 = vmatpush3.msra.mxu1 %v47_v14 }
  0x20   :  { %305 = vmatprep.subr.mxu0 %v46_v15  ;;  %346 = vmatprep.subr.mxu1 %v46_v15 }
  0x21   :  { %306 = vmatpush3.msra.mxu0 %v46_v15  ;;  %362 = vmatpush3.msra.mxu1 %v46_v15 }
  0x22   :  { %307 = vmatprep.mubr.f32.mxu0 %v30_v16  ;;  %319 = vmatprep.mubr.f32.mxu1 %v38_v17 }
  0x23   :  { %308 = vmatmul.mubr.f32.vlgmr.msra.gmra.mxu0 %v31_v18  ;;  %320 = vmatmul.mubr.f32.vlgmr.msra.gmra.mxu1 %v39_v19 }
  0x24   :  { %310 = vmatprep.mubr.f32.mxu0 %v32_v20  ;;  %322 = vmatprep.mubr.f32.mxu1 %v40_v21 }
  0x27   :  { %311 = vmatmul.mubr.f32.gmra.mxu0 %v33_v22  ;;  %323 = vmatmul.mubr.f32.gmra.mxu1 %v41_v23 }
  0x28   :  { %313 = vmatprep.mubr.f32.mxu0 %v34_v24  ;;  %325 = vmatprep.mubr.f32.mxu1 %v42_v25 }
  0x2b   :  { %314 = vmatmul.mubr.f32.gmra.mxu0 %v35_v26  ;;  %326 = vmatmul.mubr.f32.gmra.mxu1 %v43_v27 }
  0x2c   :  { %316 = vmatprep.mubr.f32.mxu0 %v36_v28  ;;  %328 = vmatprep.mubr.f32.mxu1 %v44_v29 }
  0x2f   :  { %317 = vmatmul.mubr.f32.gmra.mxu0 %v37_v30  ;;  %329 = vmatmul.mubr.f32.gmra.mxu1 %v45_v31 }
  0xe3   :  { %v309_v34 = vpop.f32.mrf.mxu0  ;;  %v321_v35 = vpop.f32.mrf.mxu1 }
  0xe4   :  { %v208_v38 = vadd.f32 %v309_v34, %v15_v32  ;;  %v216_v39 = vadd.f32 %v321_v35, %v23_v33 }
  0xe5   :  { %v128_v40 = vpop.f32.mrf.mxu0  ;;  %v168_v41 = vpop.f32.mrf.mxu1 }
  0xe6   :  { %224 = vst [vmem:[%s578_s3 + $0x8] sm:$0xff] %v208_v38  ;;  %232 = vst [vmem:[%s578_s3 + $0x48] sm:$0xff] %v216_v39  ;;  %v207_v44 = vadd.f32 %v128_v40, %v14_v36  ;;  %v215_v45 = vadd.f32 %v168_v41, %v22_v37 }
  0xe7   :  { %v312_v46 = vpop.f32.mrf.mxu0  ;;  %v324_v47 = vpop.f32.mrf.mxu1 }
  0xe8   :  { %223 = vst [vmem:[%s578_s3] sm:$0xff] %v207_v44  ;;  %231 = vst [vmem:[%s578_s3 + $0x40] sm:$0xff] %v215_v45  ;;  %v210_v50 = vadd.f32 %v312_v46, %v17_v42  ;;  %v218_v51 = vadd.f32 %v324_v47, %v25_v43 }
  0xe9   :  { %v138_v52 = vpop.f32.mrf.mxu0  ;;  %v178_v53 = vpop.f32.mrf.mxu1 }
  0xea   :  { %226 = vst [vmem:[%s578_s3 + $0x18] sm:$0xff] %v210_v50  ;;  %234 = vst [vmem:[%s578_s3 + $0x58] sm:$0xff] %v218_v51  ;;  %v209_v56 = vadd.f32 %v138_v52, %v16_v48  ;;  %v217_v57 = vadd.f32 %v178_v53, %v24_v49 }
  0xeb   :  { %v315_v58 = vpop.f32.mrf.mxu0  ;;  %v327_v59 = vpop.f32.mrf.mxu1 }
  0xec   :  { %225 = vst [vmem:[%s578_s3 + $0x10] sm:$0xff] %v209_v56  ;;  %233 = vst [vmem:[%s578_s3 + $0x50] sm:$0xff] %v217_v57  ;;  %v212_v62 = vadd.f32 %v315_v58, %v19_v54  ;;  %v220_v63 = vadd.f32 %v327_v59, %v27_v55 }
  0xed   :  { %v148_v0 = vpop.f32.mrf.mxu0  ;;  %v188_v1 = vpop.f32.mrf.mxu1 }
  0xee   :  { %228 = vst [vmem:[%s578_s3 + $0x28] sm:$0xff] %v212_v62  ;;  %236 = vst [vmem:[%s578_s3 + $0x68] sm:$0xff] %v220_v63  ;;  %v211_v4 = vadd.f32 %v148_v0, %v18_v60  ;;  %v219_v5 = vadd.f32 %v188_v1, %v26_v61 }
  0xef   :  { %v318_v6 = vpop.f32.mrf.mxu0  ;;  %v330_v7 = vpop.f32.mrf.mxu1 }
  0xf0   :  { %227 = vst [vmem:[%s578_s3 + $0x20] sm:$0xff] %v211_v4  ;;  %235 = vst [vmem:[%s578_s3 + $0x60] sm:$0xff] %v219_v5  ;;  %v214_v10 = vadd.f32 %v318_v6, %v21_v2  ;;  %v222_v11 = vadd.f32 %v330_v7, %v29_v3 }
  0xf1   :  { %v158_v12 = vpop.f32.mrf.mxu0  ;;  %v198_v13 = vpop.f32.mrf.mxu1 }
  0xf2   :  { %230 = vst [vmem:[%s578_s3 + $0x38] sm:$0xff] %v214_v10  ;;  %238 = vst [vmem:[%s578_s3 + $0x78] sm:$0xff] %v222_v11  ;;  %v213_v14 = vadd.f32 %v158_v12, %v20_v8  ;;  %v221_v15 = vadd.f32 %v198_v13, %v28_v9 }
  0xf4   :  { %229 = vst [vmem:[%s578_s3 + $0x30] sm:$0xff] %v213_v14  ;;  %237 = vst [vmem:[%s578_s3 + $0x70] sm:$0xff] %v221_v15 }

// kernel: graphconv_encoder_forward.5
= control target key start
LH: loop header
LB: loop body
LE: loop exit
PB: predicated region body
PF: predicated region fallthrough
CT: control target
= control target key end

     0   :  { %s1490_s1 = inlined_call_operand.vmem [shape: f32[128,128], index: 1, kind: input, shape index: {}, may-alias: {1,2}]   ;;  %s1491_s0 = inlined_call_operand.vmem [shape: f32[128,128], index: 0, kind: input, shape index: {}]   ;;  %s1492_s3 = inlined_call_operand.vmem [shape: f32[128,128], index: 3, kind: input, shape index: {}]   ;;  %s1493_s4 = inlined_call_operand.vmem [shape: f32[128,128], index: 4, kind: input, shape index: {}]   ;;  %s1494_s2 = inlined_call_operand.vmem [shape: f32[128,128], index: 2, kind: input, shape index: {}, may-alias: {1,2}]   ;;  %s1495_s5 = inlined_call_operand.vmem [shape: f32[1,128], index: 5, kind: input, shape index: {}]   ;;  %s1496_s6 = inlined_call_operand.vmem [shape: f32[1,128], index: 6, kind: input, shape index: {}]   ;;  %s1497_s7 = inlined_call_operand.vmem [shape: f32[128,128], index: 7, kind: output, shape index: {}]  }
   0x1   :  { %v93_v0 = vld [vmem:[%s1490_s1 + $0x78] sm:$0xff]  ;;  %v92_v1 = vld [vmem:[%s1490_s1 + $0x70] sm:$0xff]  ;;  %v91_v2 = vld [vmem:[%s1490_s1 + $0x68] sm:$0xff] }
   0x2   :  { %824 = vmatprep.subr.mxu0 %v93_v0  ;;  %v90_v3 = vld [vmem:[%s1490_s1 + $0x60] sm:$0xff]  ;;  %v89_v5 = vld [vmem:[%s1490_s1 + $0x58] sm:$0xff]  ;;  %v88_v6 = vld [vmem:[%s1490_s1 + $0x50] sm:$0xff] }
   0x3   :  { %825 = vmatpush3.msra.mxu0 %v93_v0  ;;  %v62_v4 = vld [vmem:[%s1491_s0] sm:$0xff]  ;;  %v87_v7 = vld [vmem:[%s1490_s1 + $0x48] sm:$0xff]  ;;  %v305_v8 = vld [vmem:[%s1492_s3 + $0x78] sm:$0xff] }
   0x4   :  { %826 = vmatprep.subr.mxu0 %v92_v1  ;;  %856 = vmatprep.mubr.f32.mxu0 %v62_v4  ;;  %v304_v9 = vld [vmem:[%s1492_s3 + $0x70] sm:$0xff]  ;;  %v86_v10 = vld [vmem:[%s1490_s1 + $0x40] sm:$0xff]  ;;  %v303_v11 = vld [vmem:[%s1492_s3 + $0x68] sm:$0xff] }
   0x5   :  { %827 = vmatpush3.msra.mxu0 %v92_v1  ;;  %880 = vmatprep.subr.mxu1 %v305_v8  ;;  %v85_v12 = vld [vmem:[%s1490_s1 + $0x38] sm:$0xff]  ;;  %v302_v13 = vld [vmem:[%s1492_s3 + $0x60] sm:$0xff]  ;;  %v84_v14 = vld [vmem:[%s1490_s1 + $0x30] sm:$0xff] }
   0x6   :  { %828 = vmatprep.subr.mxu0 %v91_v2  ;;  %881 = vmatpush3.msra.mxu1 %v305_v8  ;;  %v301_v15 = vld [vmem:[%s1492_s3 + $0x58] sm:$0xff]  ;;  %v83_v16 = vld [vmem:[%s1490_s1 + $0x28] sm:$0xff]  ;;  %v300_v17 = vld [vmem:[%s1492_s3 + $0x50] sm:$0xff] }
   0x7   :  { %829 = vmatpush3.msra.mxu0 %v91_v2  ;;  %882 = vmatprep.subr.mxu1 %v304_v9  ;;  %v82_v18 = vld [vmem:[%s1490_s1 + $0x20] sm:$0xff]  ;;  %v299_v19 = vld [vmem:[%s1492_s3 + $0x48] sm:$0xff]  ;;  %v81_v20 = vld [vmem:[%s1490_s1 + $0x18] sm:$0xff] }
   0x8   :  { %830 = vmatprep.subr.mxu0 %v90_v3  ;;  %883 = vmatpush3.msra.mxu1 %v304_v9  ;;  %v298_v21 = vld [vmem:[%s1492_s3 + $0x40] sm:$0xff]  ;;  %v80_v22 = vld [vmem:[%s1490_s1 + $0x10] sm:$0xff]  ;;  %v297_v23 = vld [vmem:[%s1492_s3 + $0x38] sm:$0xff] }
   0x9   :  { %831 = vmatpush3.msra.mxu0 %v90_v3  ;;  %884 = vmatprep.subr.mxu1 %v303_v11  ;;  %v79_v24 = vld [vmem:[%s1490_s1 + $0x8] sm:$0xff]  ;;  %v296_v25 = vld [vmem:[%s1492_s3 + $0x30] sm:$0xff]  ;;  %v78_v26 = vld [vmem:[%s1490_s1] sm:$0xff] }
   0xa   :  { %832 = vmatprep.subr.mxu0 %v89_v5  ;;  %885 = vmatpush3.msra.mxu1 %v303_v11  ;;  %v295_v27 = vld [vmem:[%s1492_s3 + $0x28] sm:$0xff]  ;;  %v1154_v29 = vld [vmem:[%s1493_s4 + $0x78] sm:$0xff]  ;;  %v64_v30 = vld [vmem:[%s1491_s0 + $0x10] sm:$0xff] }
   0xb   :  { %833 = vmatpush3.msra.mxu0 %v89_v5  ;;  %886 = vmatprep.subr.mxu1 %v302_v13  ;;  %v63_v28 = vld [vmem:[%s1491_s0 + $0x8] sm:$0xff]  ;;  %v1162_v31 = vld [vmem:[%s1493_s4 + $0x70] sm:$0xff]  ;;  %v294_v32 = vld [vmem:[%s1492_s3 + $0x20] sm:$0xff] }
   0xc   :  { %834 = vmatprep.subr.mxu0 %v88_v6  ;;  %887 = vmatpush3.msra.mxu1 %v302_v13  ;;  %v65_v33 = vld [vmem:[%s1491_s0 + $0x18] sm:$0xff]  ;;  %v1175_v34 = vld [vmem:[%s1493_s4 + $0x68] sm:$0xff]  ;;  %v66_v35 = vld [vmem:[%s1491_s0 + $0x20] sm:$0xff] }
   0xd   :  { %835 = vmatpush3.msra.mxu0 %v88_v6  ;;  %888 = vmatprep.subr.mxu1 %v301_v15  ;;  %v1185_v36 = vld [vmem:[%s1493_s4 + $0x60] sm:$0xff]  ;;  %v293_v37 = vld [vmem:[%s1492_s3 + $0x18] sm:$0xff]  ;;  %v67_v38 = vld [vmem:[%s1491_s0 + $0x28] sm:$0xff] }
   0xe   :  { %836 = vmatprep.subr.mxu0 %v87_v7  ;;  %889 = vmatpush3.msra.mxu1 %v301_v15  ;;  %v1198_v39 = vld [vmem:[%s1493_s4 + $0x58] sm:$0xff]  ;;  %v68_v40 = vld [vmem:[%s1491_s0 + $0x30] sm:$0xff]  ;;  %v1221_v44 = vld [vmem:[%s1493_s4 + $0x48] sm:$0xff] }
   0xf   :  { %837 = vmatpush3.msra.mxu0 %v87_v7  ;;  %890 = vmatprep.subr.mxu1 %v300_v17  ;;  %v1208_v41 = vld [vmem:[%s1493_s4 + $0x50] sm:$0xff]  ;;  %v69_v43 = vld [vmem:[%s1491_s0 + $0x38] sm:$0xff]  ;;  %v70_v45 = vld [vmem:[%s1491_s0 + $0x40] sm:$0xff] }
  0x10   :  { %838 = vmatprep.subr.mxu0 %v86_v10  ;;  %891 = vmatpush3.msra.mxu1 %v300_v17  ;;  %v292_v42 = vld [vmem:[%s1492_s3 + $0x10] sm:$0xff]  ;;  %v1231_v46 = vld [vmem:[%s1493_s4 + $0x40] sm:$0xff]  ;;  %v291_v47 = vld [vmem:[%s1492_s3 + $0x8] sm:$0xff] }
  0x11   :  { %839 = vmatpush3.msra.mxu0 %v86_v10  ;;  %892 = vmatprep.subr.mxu1 %v299_v19  ;;  %v71_v48 = vld [vmem:[%s1491_s0 + $0x48] sm:$0xff]  ;;  %v1244_v49 = vld [vmem:[%s1493_s4 + $0x38] sm:$0xff]  ;;  %v72_v50 = vld [vmem:[%s1491_s0 + $0x50] sm:$0xff] }
  0x12   :  { %840 = vmatprep.subr.mxu0 %v85_v12  ;;  %893 = vmatpush3.msra.mxu1 %v299_v19  ;;  %v1254_v51 = vld [vmem:[%s1493_s4 + $0x30] sm:$0xff]  ;;  %v73_v52 = vld [vmem:[%s1491_s0 + $0x58] sm:$0xff]  ;;  %v1264_v53 = vld [vmem:[%s1493_s4 + $0x28] sm:$0xff] }
  0x13   :  { %841 = vmatpush3.msra.mxu0 %v85_v12  ;;  %894 = vmatprep.subr.mxu1 %v298_v21  ;;  %v74_v54 = vld [vmem:[%s1491_s0 + $0x60] sm:$0xff]  ;;  %v75_v56 = vld [vmem:[%s1491_s0 + $0x68] sm:$0xff]  ;;  %v1284_v57 = vld [vmem:[%s1493_s4 + $0x18] sm:$0xff] }
  0x14   :  { %842 = vmatprep.subr.mxu0 %v84_v14  ;;  %895 = vmatpush3.msra.mxu1 %v298_v21  ;;  %v1274_v55 = vld [vmem:[%s1493_s4 + $0x20] sm:$0xff]  ;;  %v76_v58 = vld [vmem:[%s1491_s0 + $0x70] sm:$0xff]  ;;  %v77_v59 = vld [vmem:[%s1491_s0 + $0x78] sm:$0xff] }
  0x15   :  { %843 = vmatpush3.msra.mxu0 %v84_v14  ;;  %896 = vmatprep.subr.mxu1 %v297_v23  ;;  %v1299_v60 = vld [vmem:[%s1493_s4 + $0x10] sm:$0xff]  ;;  %v290_v61 = vld [vmem:[%s1492_s3] sm:$0xff]  ;;  %v1309_v62 = vld [vmem:[%s1493_s4 + $0x8] sm:$0xff] }
  0x16   :  { %844 = vmatprep.subr.mxu0 %v83_v16  ;;  %897 = vmatpush3.msra.mxu1 %v297_v23  ;;  %v1317_v63 = vld [vmem:[%s1493_s4] sm:$0xff]  ;;  %v459_v1 = vld [vmem:[%s1494_s2 + $0x8] sm:$0xff]  ;;  %v460_v2 = vld [vmem:[%s1494_s2 + $0x10] sm:$0xff] }
  0x17   :  { %845 = vmatpush3.msra.mxu0 %v83_v16  ;;  %898 = vmatprep.subr.mxu1 %v296_v25  ;;  %v458_v0 = vld [vmem:[%s1494_s2] sm:$0xff]  ;;  %v461_v3 = vld [vmem:[%s1494_s2 + $0x18] sm:$0xff]  ;;  %v463_v5 = vld [vmem:[%s1494_s2 + $0x28] sm:$0xff] }
  0x18   :  { %846 = vmatprep.subr.mxu0 %v82_v18  ;;  %899 = vmatpush3.msra.mxu1 %v296_v25  ;;  %v462_v4 = vld [vmem:[%s1494_s2 + $0x20] sm:$0xff]  ;;  %v464_v6 = vld [vmem:[%s1494_s2 + $0x30] sm:$0xff]  ;;  %v465_v7 = vld [vmem:[%s1494_s2 + $0x38] sm:$0xff] }
  0x19   :  { %847 = vmatpush3.msra.mxu0 %v82_v18  ;;  %900 = vmatprep.subr.mxu1 %v295_v27  ;;  %v467_v25 = vld [vmem:[%s1494_s2 + $0x48] sm:$0xff] }
  0x1a   :  { %848 = vmatprep.subr.mxu0 %v81_v20  ;;  %901 = vmatpush3.msra.mxu1 %v295_v27  ;;  %v469_v27 = vld [vmem:[%s1494_s2 + $0x58] sm:$0xff] }
  0x1b   :  { %849 = vmatpush3.msra.mxu0 %v81_v20  ;;  %902 = vmatprep.subr.mxu1 %v294_v32 }
  0x1c   :  { %850 = vmatprep.subr.mxu0 %v80_v22  ;;  %903 = vmatpush3.msra.mxu1 %v294_v32 }
  0x1d   :  { %851 = vmatpush3.msra.mxu0 %v80_v22  ;;  %904 = vmatprep.subr.mxu1 %v293_v37 }
  0x1e   :  { %852 = vmatprep.subr.mxu0 %v79_v24  ;;  %905 = vmatpush3.msra.mxu1 %v293_v37 }
  0x1f   :  { %853 = vmatpush3.msra.mxu0 %v79_v24  ;;  %906 = vmatprep.subr.mxu1 %v292_v42  ;;  %v466_v24 = vld [vmem:[%s1494_s2 + $0x40] sm:$0xff] }
  0x20   :  { %854 = vmatprep.subr.mxu0 %v78_v26  ;;  %907 = vmatpush3.msra.mxu1 %v292_v42 }
  0x21   :  { %855 = vmatpush3.msra.mxu0 %v78_v26  ;;  %908 = vmatprep.subr.mxu1 %v291_v47  ;;  %v468_v26 = vld [vmem:[%s1494_s2 + $0x50] sm:$0xff] }
  0x22   :  { %857 = vmatmul.mubr.f32.vlgmr.msra.gmra.mxu0 %v63_v28  ;;  %936 = vmatprep.subr.mxu0 %v1154_v29  ;;  %v470_v28 = vld [vmem:[%s1494_s2 + $0x60] sm:$0xff] }
  0x23   :  { %859 = vmatprep.mubr.f32.mxu0 %v64_v30  ;;  %937 = vmatpush3.msra.mxu0 %v1154_v29  ;;  %v472_v30 = vld [vmem:[%s1494_s2 + $0x70] sm:$0xff] }
  0x24   :  { %938 = vmatprep.subr.mxu0 %v1162_v31  ;;  %909 = vmatpush3.msra.mxu1 %v291_v47 }
  0x25   :  { %939 = vmatpush3.msra.mxu0 %v1162_v31  ;;  %910 = vmatprep.subr.mxu1 %v290_v61 }
  0x26   :  { %860 = vmatmul.mubr.f32.gmra.mxu0 %v65_v33  ;;  %940 = vmatprep.subr.mxu0 %v1175_v34 }
  0x27   :  { %862 = vmatprep.mubr.f32.mxu0 %v66_v35  ;;  %941 = vmatpush3.msra.mxu0 %v1175_v34  ;;  %v1403_v35 = vld [vmem:[%s1495_s5] ss:$0 sm:$0xff] }
  0x28   :  { %942 = vmatprep.subr.mxu0 %v1185_v36  ;;  %911 = vmatpush3.msra.mxu1 %v290_v61 }
  0x29   :  { %943 = vmatpush3.msra.mxu0 %v1185_v36  ;;  %992 = vmatprep.subr.mxu1 %v1154_v29 }
  0x2a   :  { %863 = vmatmul.mubr.f32.gmra.mxu0 %v67_v38  ;;  %944 = vmatprep.subr.mxu0 %v1198_v39 }
  0x2b   :  { %865 = vmatprep.mubr.f32.mxu0 %v68_v40  ;;  %945 = vmatpush3.msra.mxu0 %v1198_v39  ;;  %v1409_v40 = vld [vmem:[%s1496_s6] ss:$0 sm:$0xff] }
  0x2c   :  { %946 = vmatprep.subr.mxu0 %v1208_v41 }
  0x2d   :  { %947 = vmatpush3.msra.mxu0 %v1208_v41 }
  0x2e   :  { %866 = vmatmul.mubr.f32.gmra.mxu0 %v69_v43  ;;  %948 = vmatprep.subr.mxu0 %v1221_v44 }
  0x2f   :  { %868 = vmatprep.mubr.f32.mxu0 %v70_v45  ;;  %949 = vmatpush3.msra.mxu0 %v1221_v44 }
  0x30   :  { %950 = vmatprep.subr.mxu0 %v1231_v46 }
  0x31   :  { %951 = vmatpush3.msra.mxu0 %v1231_v46 }
  0x32   :  { %869 = vmatmul.mubr.f32.gmra.mxu0 %v71_v48  ;;  %952 = vmatprep.subr.mxu0 %v1244_v49 }
  0x33   :  { %871 = vmatprep.mubr.f32.mxu0 %v72_v50  ;;  %953 = vmatpush3.msra.mxu0 %v1244_v49 }
  0x34   :  { %954 = vmatprep.subr.mxu0 %v1254_v51 }
  0x35   :  { %955 = vmatpush3.msra.mxu0 %v1254_v51 }
  0x36   :  { %872 = vmatmul.mubr.f32.gmra.mxu0 %v73_v52  ;;  %956 = vmatprep.subr.mxu0 %v1264_v53 }
  0x37   :  { %874 = vmatprep.mubr.f32.mxu0 %v74_v54  ;;  %957 = vmatpush3.msra.mxu0 %v1264_v53 }
  0x38   :  { %958 = vmatprep.subr.mxu0 %v1274_v55 }
  0x39   :  { %959 = vmatpush3.msra.mxu0 %v1274_v55 }
  0x3a   :  { %875 = vmatmul.mubr.f32.gmra.mxu0 %v75_v56  ;;  %960 = vmatprep.subr.mxu0 %v1284_v57 }
  0x3b   :  { %877 = vmatprep.mubr.f32.mxu0 %v76_v58  ;;  %961 = vmatpush3.msra.mxu0 %v1284_v57 }
  0x3c   :  { %962 = vmatprep.subr.mxu0 %v1299_v60 }
  0x3d   :  { %963 = vmatpush3.msra.mxu0 %v1299_v60 }
  0x3e   :  { %878 = vmatmul.mubr.f32.gmra.mxu0 %v77_v59  ;;  %964 = vmatprep.subr.mxu0 %v1309_v62 }
  0x3f   :  { %965 = vmatpush3.msra.mxu0 %v1309_v62  ;;  %968 = vmatprep.mubr.f32.mxu0 %v458_v0 }
  0x40   :  { %966 = vmatprep.subr.mxu0 %v1317_v63 }
  0x41   :  { %967 = vmatpush3.msra.mxu0 %v1317_v63 }
  0x42   :  { %969 = vmatmul.mubr.f32.vlgmr.msra.gmra.mxu0 %v459_v1 }
  0x43   :  { %971 = vmatprep.mubr.f32.mxu0 %v460_v2 }
  0x46   :  { %972 = vmatmul.mubr.f32.gmra.mxu0 %v461_v3 }
  0x47   :  { %974 = vmatprep.mubr.f32.mxu0 %v462_v4 }
  0x4a   :  { %975 = vmatmul.mubr.f32.gmra.mxu0 %v463_v5 }
  0x4b   :  { %977 = vmatprep.mubr.f32.mxu0 %v464_v6 }
  0x4e   :  { %978 = vmatmul.mubr.f32.gmra.mxu0 %v465_v7 }
  0xe2   :  { %v858_v8 = vpop.f32.mrf.mxu0 }
  0xe4   :  { %v160_v9 = vpop.f32.mrf.mxu0 }
  0xe5   :  { %912 = vmatprep.mubr.f32.mxu1 %v160_v9 }
  0xe6   :  { %v861_v10 = vpop.f32.mrf.mxu0  ;;  %913 = vmatmul.mubr.f32.vlgmr.msra.gmra.mxu1 %v858_v8 }
  0xe7   :  { %1008 = vmatpush3.msra.mxu1 %v1154_v29  ;;  %v471_v29 = vld [vmem:[%s1494_s2 + $0x68] sm:$0xff] }
  0xe8   :  { %993 = vmatprep.subr.mxu1 %v1162_v31  ;;  %v170_v11 = vpop.f32.mrf.mxu0 }
  0xe9   :  { %1009 = vmatpush3.msra.mxu1 %v1162_v31  ;;  %915 = vmatprep.mubr.f32.mxu1 %v170_v11  ;;  %v473_v31 = vld [vmem:[%s1494_s2 + $0x78] sm:$0xff] }
  0xea   :  { %994 = vmatprep.subr.mxu1 %v1175_v34  ;;  %v864_v12 = vpop.f32.mrf.mxu0  ;;  %916 = vmatmul.mubr.f32.gmra.mxu1 %v861_v10 }
  0xeb   :  { %1010 = vmatpush3.msra.mxu1 %v1175_v34 }
  0xec   :  { %995 = vmatprep.subr.mxu1 %v1185_v36  ;;  %v180_v13 = vpop.f32.mrf.mxu0 }
  0xed   :  { %1011 = vmatpush3.msra.mxu1 %v1185_v36  ;;  %918 = vmatprep.mubr.f32.mxu1 %v180_v13 }
  0xee   :  { %996 = vmatprep.subr.mxu1 %v1198_v39  ;;  %v867_v14 = vpop.f32.mrf.mxu0  ;;  %919 = vmatmul.mubr.f32.gmra.mxu1 %v864_v12 }
  0xef   :  { %1012 = vmatpush3.msra.mxu1 %v1198_v39 }
  0xf0   :  { %997 = vmatprep.subr.mxu1 %v1208_v41  ;;  %v190_v15 = vpop.f32.mrf.mxu0 }
  0xf1   :  { %1013 = vmatpush3.msra.mxu1 %v1208_v41  ;;  %921 = vmatprep.mubr.f32.mxu1 %v190_v15 }
  0xf2   :  { %998 = vmatprep.subr.mxu1 %v1221_v44  ;;  %v870_v16 = vpop.f32.mrf.mxu0  ;;  %922 = vmatmul.mubr.f32.gmra.mxu1 %v867_v14 }
  0xf3   :  { %1014 = vmatpush3.msra.mxu1 %v1221_v44 }
  0xf4   :  { %999 = vmatprep.subr.mxu1 %v1231_v46  ;;  %v200_v17 = vpop.f32.mrf.mxu0 }
  0xf5   :  { %1015 = vmatpush3.msra.mxu1 %v1231_v46  ;;  %924 = vmatprep.mubr.f32.mxu1 %v200_v17 }
  0xf6   :  { %1000 = vmatprep.subr.mxu1 %v1244_v49  ;;  %v873_v18 = vpop.f32.mrf.mxu0  ;;  %925 = vmatmul.mubr.f32.gmra.mxu1 %v870_v16 }
  0xf7   :  { %1016 = vmatpush3.msra.mxu1 %v1244_v49 }
  0xf8   :  { %1001 = vmatprep.subr.mxu1 %v1254_v51  ;;  %v210_v19 = vpop.f32.mrf.mxu0 }
  0xf9   :  { %1017 = vmatpush3.msra.mxu1 %v1254_v51  ;;  %927 = vmatprep.mubr.f32.mxu1 %v210_v19 }
  0xfa   :  { %1002 = vmatprep.subr.mxu1 %v1264_v53  ;;  %v876_v20 = vpop.f32.mrf.mxu0  ;;  %928 = vmatmul.mubr.f32.gmra.mxu1 %v873_v18 }
  0xfb   :  { %1018 = vmatpush3.msra.mxu1 %v1264_v53 }
  0xfc   :  { %1003 = vmatprep.subr.mxu1 %v1274_v55  ;;  %v220_v21 = vpop.f32.mrf.mxu0 }
  0xfd   :  { %1019 = vmatpush3.msra.mxu1 %v1274_v55  ;;  %930 = vmatprep.mubr.f32.mxu1 %v220_v21 }
  0xfe   :  { %1004 = vmatprep.subr.mxu1 %v1284_v57  ;;  %v879_v22 = vpop.f32.mrf.mxu0  ;;  %931 = vmatmul.mubr.f32.gmra.mxu1 %v876_v20 }
  0xff   :  { %1020 = vmatpush3.msra.mxu1 %v1284_v57 }
 0x100   :  { %1005 = vmatprep.subr.mxu1 %v1299_v60  ;;  %v230_v23 = vpop.f32.mrf.mxu0 }
 0x101   :  { %1021 = vmatpush3.msra.mxu1 %v1299_v60  ;;  %933 = vmatprep.mubr.f32.mxu1 %v230_v23 }
 0x102   :  { %1006 = vmatprep.subr.mxu1 %v1309_v62  ;;  %934 = vmatmul.mubr.f32.gmra.mxu1 %v879_v22  ;;  %v970_v32 = vpop.f32.mrf.mxu0 }
 0x103   :  { %1022 = vmatpush3.msra.mxu1 %v1309_v62  ;;  %980 = vmatprep.mubr.f32.mxu1 %v466_v24 }
 0x104   :  { %1007 = vmatprep.subr.mxu1 %v1317_v63  ;;  %v556_v33 = vpop.f32.mrf.mxu0 }
 0x105   :  { %1023 = vmatpush3.msra.mxu1 %v1317_v63 }
 0x106   :  { %981 = vmatmul.mubr.f32.vlgmr.msra.gmra.mxu1 %v467_v25  ;;  %v973_v34 = vpop.f32.mrf.mxu0 }
 0x107   :  { %983 = vmatprep.mubr.f32.mxu1 %v468_v26 }
 0x108   :  { %v566_v36 = vpop.f32.mrf.mxu0 }
 0x10a   :  { %984 = vmatmul.mubr.f32.gmra.mxu1 %v469_v27  ;;  %v976_v41 = vpop.f32.mrf.mxu0 }
 0x10b   :  { %986 = vmatprep.mubr.f32.mxu1 %v470_v28 }
 0x10c   :  { %v576_v49 = vpop.f32.mrf.mxu0 }
 0x10e   :  { %987 = vmatmul.mubr.f32.gmra.mxu1 %v471_v29  ;;  %v979_v60 = vpop.f32.mrf.mxu0 }
 0x10f   :  { %989 = vmatprep.mubr.f32.mxu1 %v472_v30 }
 0x110   :  { %v586_v7 = vpop.f32.mrf.mxu0 }
 0x112   :  { %990 = vmatmul.mubr.f32.gmra.mxu1 %v473_v31 }
 0x1a6   :  { %v914_v37 = vpop.f32.mrf.mxu1 }
 0x1a7   :  { %v385_v38 = vadd.f32 %v914_v37, %v1403_v35 }
 0x1a8   :  { %v379_v39 = vpop.f32.mrf.mxu1 }
 0x1a9   :  { %v380_v42 = vadd.f32 %v1403_v35, %v379_v39  ;;  %v636_v43 = vadd.f32 %v970_v32, %v385_v38 }
 0x1aa   :  { %v917_v44 = vpop.f32.mrf.mxu1 }
 0x1ab   :  { %vm653_vm0 = vcmp.ge.f32.partialorder %v636_v43, 0.0  ;;  %v675_v45 = vmul.f32 %v1409_v40, %v636_v43  ;;  %v395_v46 = vadd.f32 %v917_v44, %v1403_v35  ;;  %v635_v47 = vadd.f32 %v556_v33, %v380_v42 }
 0x1ac   :  { %v389_v48 = vpop.f32.mrf.mxu1 }
 0x1ad   :  { %v691_v50 = vsel %vm653_vm0, %v636_v43, %v675_v45  ;;  %vm652_vm1 = vcmp.ge.f32.partialorder %v635_v47, 0.0  ;;  %v674_v51 = vmul.f32 %v1409_v40, %v635_v47  ;;  %v390_v52 = vadd.f32 %v1403_v35, %v389_v48 }
 0x1ae   :  { %707 = vst [vmem:[%s1497_s7 + $0x8] sm:$0xff] %v691_v50  ;;  %v638_v53 = vadd.f32 %v973_v34, %v395_v46  ;;  %v920_v54 = vpop.f32.mrf.mxu1 }
 0x1af   :  { %v690_v55 = vsel %vm652_vm1, %v635_v47, %v674_v51  ;;  %v405_v56 = vadd.f32 %v920_v54, %v1403_v35  ;;  %v637_v57 = vadd.f32 %v566_v36, %v390_v52 }
 0x1b0   :  { %706 = vst [vmem:[%s1497_s7] sm:$0xff] %v690_v55  ;;  %vm655_vm2 = vcmp.ge.f32.partialorder %v638_v53, 0.0  ;;  %v677_v58 = vmul.f32 %v1409_v40, %v638_v53  ;;  %v399_v59 = vpop.f32.mrf.mxu1 }
 0x1b1   :  { %vm654_vm3 = vcmp.ge.f32.partialorder %v637_v57, 0.0  ;;  %v676_v61 = vmul.f32 %v1409_v40, %v637_v57  ;;  %v400_v62 = vadd.f32 %v1403_v35, %v399_v59  ;;  %v640_v63 = vadd.f32 %v976_v41, %v405_v56 }
 0x1b2   :  { %v693_v0 = vsel %vm655_vm2, %v638_v53, %v677_v58  ;;  %v923_v1 = vpop.f32.mrf.mxu1 }
 0x1b3   :  { %709 = vst [vmem:[%s1497_s7 + $0x18] sm:$0xff] %v693_v0  ;;  %v692_v2 = vsel %vm654_vm3, %v637_v57, %v676_v61  ;;  %vm657_vm4 = vcmp.ge.f32.partialorder %v640_v63, 0.0  ;;  %v679_v3 = vmul.f32 %v1409_v40, %v640_v63  ;;  %v415_v4 = vadd.f32 %v923_v1, %v1403_v35 }
 0x1b4   :  { %708 = vst [vmem:[%s1497_s7 + $0x10] sm:$0xff] %v692_v2  ;;  %v639_v5 = vadd.f32 %v576_v49, %v400_v62  ;;  %v409_v6 = vpop.f32.mrf.mxu1 }
 0x1b5   :  { %v695_v8 = vsel %vm657_vm4, %v640_v63, %v679_v3  ;;  %v410_v9 = vadd.f32 %v1403_v35, %v409_v6  ;;  %v642_v10 = vadd.f32 %v979_v60, %v415_v4 }
 0x1b6   :  { %711 = vst [vmem:[%s1497_s7 + $0x28] sm:$0xff] %v695_v8  ;;  %vm656_vm5 = vcmp.ge.f32.partialorder %v639_v5, 0.0  ;;  %v678_v11 = vmul.f32 %v1409_v40, %v639_v5  ;;  %v926_v12 = vpop.f32.mrf.mxu1 }
 0x1b7   :  { %vm659_vm6 = vcmp.ge.f32.partialorder %v642_v10, 0.0  ;;  %v681_v13 = vmul.f32 %v1409_v40, %v642_v10  ;;  %v641_v14 = vadd.f32 %v586_v7, %v410_v9  ;;  %v425_v26 = vadd.f32 %v926_v12, %v1403_v35 }
 0x1b8   :  { %v694_v15 = vsel %vm656_vm5, %v639_v5, %v678_v11  ;;  %v419_v16 = vpop.f32.mrf.mxu1 }
 0x1b9   :  { %710 = vst [vmem:[%s1497_s7 + $0x20] sm:$0xff] %v694_v15  ;;  %v697_v17 = vsel %vm659_vm6, %v642_v10, %v681_v13  ;;  %vm658_vm7 = vcmp.ge.f32.partialorder %v641_v14, 0.0  ;;  %v680_v18 = vmul.f32 %v1409_v40, %v641_v14  ;;  %v420_v28 = vadd.f32 %v1403_v35, %v419_v16 }
 0x1ba   :  { %713 = vst [vmem:[%s1497_s7 + $0x38] sm:$0xff] %v697_v17  ;;  %v929_v19 = vpop.f32.mrf.mxu1 }
 0x1bb   :  { %v696_v20 = vsel %vm658_vm7, %v641_v14, %v680_v18  ;;  %v435_v31 = vadd.f32 %v929_v19, %v1403_v35 }
 0x1bc   :  { %712 = vst [vmem:[%s1497_s7 + $0x30] sm:$0xff] %v696_v20  ;;  %v429_v21 = vpop.f32.mrf.mxu1 }
 0x1bd   :  { %v430_v34 = vadd.f32 %v1403_v35, %v429_v21 }
 0x1be   :  { %v932_v22 = vpop.f32.mrf.mxu1 }
 0x1bf   :  { %v445_v41 = vadd.f32 %v932_v22, %v1403_v35 }
 0x1c0   :  { %v439_v23 = vpop.f32.mrf.mxu1 }
 0x1c1   :  { %v440_v46 = vadd.f32 %v1403_v35, %v439_v23 }
 0x1c2   :  { %v935_v24 = vpop.f32.mrf.mxu1 }
 0x1c3   :  { %v455_v51 = vadd.f32 %v935_v24, %v1403_v35 }
 0x1c4   :  { %v449_v25 = vpop.f32.mrf.mxu1 }
 0x1c5   :  { %v450_v56 = vadd.f32 %v1403_v35, %v449_v25 }
 0x1c6   :  { %v982_v27 = vpop.f32.mrf.mxu1 }
 0x1c7   :  { %v644_v29 = vadd.f32 %v982_v27, %v425_v26 }
 0x1c8   :  { %v596_v30 = vpop.f32.mrf.mxu1 }
 0x1c9   :  { %vm661_vm8 = vcmp.ge.f32.partialorder %v644_v29, 0.0  ;;  %v683_v32 = vmul.f32 %v1409_v40, %v644_v29  ;;  %v643_v33 = vadd.f32 %v596_v30, %v420_v28 }
 0x1ca   :  { %v985_v36 = vpop.f32.mrf.mxu1 }
 0x1cb   :  { %v699_v37 = vsel %vm661_vm8, %v644_v29, %v683_v32  ;;  %vm660_vm9 = vcmp.ge.f32.partialorder %v643_v33, 0.0  ;;  %v682_v38 = vmul.f32 %v1409_v40, %v643_v33  ;;  %v646_v39 = vadd.f32 %v985_v36, %v435_v31 }
 0x1cc   :  { %715 = vst [vmem:[%s1497_s7 + $0x48] sm:$0xff] %v699_v37  ;;  %v606_v42 = vpop.f32.mrf.mxu1 }
 0x1cd   :  { %v698_v43 = vsel %vm660_vm9, %v643_v33, %v682_v38  ;;  %vm663_vm10 = vcmp.ge.f32.partialorder %v646_v39, 0.0  ;;  %v685_v44 = vmul.f32 %v1409_v40, %v646_v39  ;;  %v645_v45 = vadd.f32 %v606_v42, %v430_v34 }
 0x1ce   :  { %714 = vst [vmem:[%s1497_s7 + $0x40] sm:$0xff] %v698_v43  ;;  %v988_v47 = vpop.f32.mrf.mxu1 }
 0x1cf   :  { %v701_v48 = vsel %vm663_vm10, %v646_v39, %v685_v44  ;;  %vm662_vm11 = vcmp.ge.f32.partialorder %v645_v45, 0.0  ;;  %v684_v49 = vmul.f32 %v1409_v40, %v645_v45  ;;  %v648_v50 = vadd.f32 %v988_v47, %v445_v41 }
 0x1d0   :  { %717 = vst [vmem:[%s1497_s7 + $0x58] sm:$0xff] %v701_v48  ;;  %v616_v52 = vpop.f32.mrf.mxu1 }
 0x1d1   :  { %v700_v53 = vsel %vm662_vm11, %v645_v45, %v684_v49  ;;  %vm665_vm12 = vcmp.ge.f32.partialorder %v648_v50, 0.0  ;;  %v687_v54 = vmul.f32 %v1409_v40, %v648_v50  ;;  %v647_v55 = vadd.f32 %v616_v52, %v440_v46 }
 0x1d2   :  { %716 = vst [vmem:[%s1497_s7 + $0x50] sm:$0xff] %v700_v53  ;;  %v991_v57 = vpop.f32.mrf.mxu1 }
 0x1d3   :  { %v703_v58 = vsel %vm665_vm12, %v648_v50, %v687_v54  ;;  %vm664_vm13 = vcmp.ge.f32.partialorder %v647_v55, 0.0  ;;  %v686_v59 = vmul.f32 %v1409_v40, %v647_v55  ;;  %v650_v60 = vadd.f32 %v991_v57, %v455_v51 }
 0x1d4   :  { %719 = vst [vmem:[%s1497_s7 + $0x68] sm:$0xff] %v703_v58  ;;  %v626_v61 = vpop.f32.mrf.mxu1 }
 0x1d5   :  { %v702_v62 = vsel %vm664_vm13, %v647_v55, %v686_v59  ;;  %vm667_vm14 = vcmp.ge.f32.partialorder %v650_v60, 0.0  ;;  %v689_v63 = vmul.f32 %v1409_v40, %v650_v60  ;;  %v649_v35 = vadd.f32 %v626_v61, %v450_v56 }
 0x1d6   :  { %718 = vst [vmem:[%s1497_s7 + $0x60] sm:$0xff] %v702_v62 }
 0x1d7   :  { %v705_v0 = vsel %vm667_vm14, %v650_v60, %v689_v63  ;;  %vm666_vm15 = vcmp.ge.f32.partialorder %v649_v35, 0.0  ;;  %v688_v1 = vmul.f32 %v1409_v40, %v649_v35 }
 0x1d8   :  { %721 = vst [vmem:[%s1497_s7 + $0x78] sm:$0xff] %v705_v0 }
 0x1d9   :  { %v704_v2 = vsel %vm666_vm15, %v649_v35, %v688_v1 }
 0x1da   :  { %720 = vst [vmem:[%s1497_s7 + $0x70] sm:$0xff] %v704_v2 }

// kernel: graphconv_encoder_forward.3
= control target key start
LH: loop header
LB: loop body
LE: loop exit
PB: predicated region body
PF: predicated region fallthrough
CT: control target
= control target key end

     0   :  { %s1554_s1 = inlined_call_operand.vmem [shape: f32[128,128], index: 1, kind: input, shape index: {}, may-alias: {1,2}]   ;;  %s1555_s0 = inlined_call_operand.vmem [shape: f32[128,128], index: 0, kind: input, shape index: {}]   ;;  %s1556_s3 = inlined_call_operand.vmem [shape: f32[128,128], index: 3, kind: input, shape index: {}]   ;;  %s1557_s4 = inlined_call_operand.vmem [shape: f32[128,128], index: 4, kind: input, shape index: {}]   ;;  %s1558_s2 = inlined_call_operand.vmem [shape: f32[128,128], index: 2, kind: input, shape index: {}, may-alias: {1,2}]   ;;  %s1559_s5 = inlined_call_operand.vmem [shape: f32[1,128], index: 5, kind: input, shape index: {}]   ;;  %s1560_s6 = inlined_call_operand.vmem [shape: f32[1,128], index: 6, kind: input, shape index: {}]   ;;  %s1561_s7 = inlined_call_operand.vmem [shape: f32[128,128], index: 7, kind: output, shape index: {}]  }
   0x1   :  { %v93_v0 = vld [vmem:[%s1554_s1 + $0x78] sm:$0xff]  ;;  %v92_v1 = vld [vmem:[%s1554_s1 + $0x70] sm:$0xff]  ;;  %v91_v2 = vld [vmem:[%s1554_s1 + $0x68] sm:$0xff] }
   0x2   :  { %872 = vmatprep.subr.mxu0 %v93_v0  ;;  %v90_v3 = vld [vmem:[%s1554_s1 + $0x60] sm:$0xff]  ;;  %v89_v5 = vld [vmem:[%s1554_s1 + $0x58] sm:$0xff]  ;;  %v88_v6 = vld [vmem:[%s1554_s1 + $0x50] sm:$0xff] }
   0x3   :  { %873 = vmatpush3.msra.mxu0 %v93_v0  ;;  %v62_v4 = vld [vmem:[%s1555_s0] sm:$0xff]  ;;  %v87_v7 = vld [vmem:[%s1554_s1 + $0x48] sm:$0xff]  ;;  %v305_v8 = vld [vmem:[%s1556_s3 + $0x78] sm:$0xff] }
   0x4   :  { %874 = vmatprep.subr.mxu0 %v92_v1  ;;  %904 = vmatprep.mubr.f32.mxu0 %v62_v4  ;;  %v304_v9 = vld [vmem:[%s1556_s3 + $0x70] sm:$0xff]  ;;  %v86_v10 = vld [vmem:[%s1554_s1 + $0x40] sm:$0xff]  ;;  %v303_v11 = vld [vmem:[%s1556_s3 + $0x68] sm:$0xff] }
   0x5   :  { %875 = vmatpush3.msra.mxu0 %v92_v1  ;;  %928 = vmatprep.subr.mxu1 %v305_v8  ;;  %v85_v12 = vld [vmem:[%s1554_s1 + $0x38] sm:$0xff]  ;;  %v302_v13 = vld [vmem:[%s1556_s3 + $0x60] sm:$0xff]  ;;  %v84_v14 = vld [vmem:[%s1554_s1 + $0x30] sm:$0xff] }
   0x6   :  { %876 = vmatprep.subr.mxu0 %v91_v2  ;;  %929 = vmatpush3.msra.mxu1 %v305_v8  ;;  %v301_v15 = vld [vmem:[%s1556_s3 + $0x58] sm:$0xff]  ;;  %v83_v16 = vld [vmem:[%s1554_s1 + $0x28] sm:$0xff]  ;;  %v300_v17 = vld [vmem:[%s1556_s3 + $0x50] sm:$0xff] }
   0x7   :  { %877 = vmatpush3.msra.mxu0 %v91_v2  ;;  %930 = vmatprep.subr.mxu1 %v304_v9  ;;  %v82_v18 = vld [vmem:[%s1554_s1 + $0x20] sm:$0xff]  ;;  %v299_v19 = vld [vmem:[%s1556_s3 + $0x48] sm:$0xff]  ;;  %v81_v20 = vld [vmem:[%s1554_s1 + $0x18] sm:$0xff] }
   0x8   :  { %878 = vmatprep.subr.mxu0 %v90_v3  ;;  %931 = vmatpush3.msra.mxu1 %v304_v9  ;;  %v298_v21 = vld [vmem:[%s1556_s3 + $0x40] sm:$0xff]  ;;  %v80_v22 = vld [vmem:[%s1554_s1 + $0x10] sm:$0xff]  ;;  %v297_v23 = vld [vmem:[%s1556_s3 + $0x38] sm:$0xff] }
   0x9   :  { %879 = vmatpush3.msra.mxu0 %v90_v3  ;;  %932 = vmatprep.subr.mxu1 %v303_v11  ;;  %v79_v24 = vld [vmem:[%s1554_s1 + $0x8] sm:$0xff]  ;;  %v296_v25 = vld [vmem:[%s1556_s3 + $0x30] sm:$0xff]  ;;  %v78_v26 = vld [vmem:[%s1554_s1] sm:$0xff] }
   0xa   :  { %880 = vmatprep.subr.mxu0 %v89_v5  ;;  %933 = vmatpush3.msra.mxu1 %v303_v11  ;;  %v295_v27 = vld [vmem:[%s1556_s3 + $0x28] sm:$0xff]  ;;  %v1202_v29 = vld [vmem:[%s1557_s4 + $0x78] sm:$0xff]  ;;  %v64_v30 = vld [vmem:[%s1555_s0 + $0x10] sm:$0xff] }
   0xb   :  { %881 = vmatpush3.msra.mxu0 %v89_v5  ;;  %934 = vmatprep.subr.mxu1 %v302_v13  ;;  %v63_v28 = vld [vmem:[%s1555_s0 + $0x8] sm:$0xff]  ;;  %v1210_v31 = vld [vmem:[%s1557_s4 + $0x70] sm:$0xff]  ;;  %v294_v32 = vld [vmem:[%s1556_s3 + $0x20] sm:$0xff] }
   0xc   :  { %882 = vmatprep.subr.mxu0 %v88_v6  ;;  %935 = vmatpush3.msra.mxu1 %v302_v13  ;;  %v65_v33 = vld [vmem:[%s1555_s0 + $0x18] sm:$0xff]  ;;  %v1223_v34 = vld [vmem:[%s1557_s4 + $0x68] sm:$0xff]  ;;  %v66_v35 = vld [vmem:[%s1555_s0 + $0x20] sm:$0xff] }
   0xd   :  { %883 = vmatpush3.msra.mxu0 %v88_v6  ;;  %936 = vmatprep.subr.mxu1 %v301_v15  ;;  %v1233_v36 = vld [vmem:[%s1557_s4 + $0x60] sm:$0xff]  ;;  %v293_v37 = vld [vmem:[%s1556_s3 + $0x18] sm:$0xff]  ;;  %v67_v38 = vld [vmem:[%s1555_s0 + $0x28] sm:$0xff] }
   0xe   :  { %884 = vmatprep.subr.mxu0 %v87_v7  ;;  %937 = vmatpush3.msra.mxu1 %v301_v15  ;;  %v1246_v39 = vld [vmem:[%s1557_s4 + $0x58] sm:$0xff]  ;;  %v68_v40 = vld [vmem:[%s1555_s0 + $0x30] sm:$0xff]  ;;  %v1269_v44 = vld [vmem:[%s1557_s4 + $0x48] sm:$0xff] }
   0xf   :  { %885 = vmatpush3.msra.mxu0 %v87_v7  ;;  %938 = vmatprep.subr.mxu1 %v300_v17  ;;  %v1256_v41 = vld [vmem:[%s1557_s4 + $0x50] sm:$0xff]  ;;  %v69_v43 = vld [vmem:[%s1555_s0 + $0x38] sm:$0xff]  ;;  %v70_v45 = vld [vmem:[%s1555_s0 + $0x40] sm:$0xff] }
  0x10   :  { %886 = vmatprep.subr.mxu0 %v86_v10  ;;  %939 = vmatpush3.msra.mxu1 %v300_v17  ;;  %v292_v42 = vld [vmem:[%s1556_s3 + $0x10] sm:$0xff]  ;;  %v1279_v46 = vld [vmem:[%s1557_s4 + $0x40] sm:$0xff]  ;;  %v291_v47 = vld [vmem:[%s1556_s3 + $0x8] sm:$0xff] }
  0x11   :  { %887 = vmatpush3.msra.mxu0 %v86_v10  ;;  %940 = vmatprep.subr.mxu1 %v299_v19  ;;  %v71_v48 = vld [vmem:[%s1555_s0 + $0x48] sm:$0xff]  ;;  %v1292_v49 = vld [vmem:[%s1557_s4 + $0x38] sm:$0xff]  ;;  %v72_v50 = vld [vmem:[%s1555_s0 + $0x50] sm:$0xff] }
  0x12   :  { %888 = vmatprep.subr.mxu0 %v85_v12  ;;  %941 = vmatpush3.msra.mxu1 %v299_v19  ;;  %v1302_v51 = vld [vmem:[%s1557_s4 + $0x30] sm:$0xff]  ;;  %v73_v52 = vld [vmem:[%s1555_s0 + $0x58] sm:$0xff]  ;;  %v1312_v53 = vld [vmem:[%s1557_s4 + $0x28] sm:$0xff] }
  0x13   :  { %889 = vmatpush3.msra.mxu0 %v85_v12  ;;  %942 = vmatprep.subr.mxu1 %v298_v21  ;;  %v74_v54 = vld [vmem:[%s1555_s0 + $0x60] sm:$0xff]  ;;  %v75_v56 = vld [vmem:[%s1555_s0 + $0x68] sm:$0xff]  ;;  %v1332_v57 = vld [vmem:[%s1557_s4 + $0x18] sm:$0xff] }
  0x14   :  { %890 = vmatprep.subr.mxu0 %v84_v14  ;;  %943 = vmatpush3.msra.mxu1 %v298_v21  ;;  %v1322_v55 = vld [vmem:[%s1557_s4 + $0x20] sm:$0xff]  ;;  %v76_v58 = vld [vmem:[%s1555_s0 + $0x70] sm:$0xff]  ;;  %v77_v59 = vld [vmem:[%s1555_s0 + $0x78] sm:$0xff] }
  0x15   :  { %891 = vmatpush3.msra.mxu0 %v84_v14  ;;  %944 = vmatprep.subr.mxu1 %v297_v23  ;;  %v1347_v60 = vld [vmem:[%s1557_s4 + $0x10] sm:$0xff]  ;;  %v290_v61 = vld [vmem:[%s1556_s3] sm:$0xff]  ;;  %v1357_v62 = vld [vmem:[%s1557_s4 + $0x8] sm:$0xff] }
  0x16   :  { %892 = vmatprep.subr.mxu0 %v83_v16  ;;  %945 = vmatpush3.msra.mxu1 %v297_v23  ;;  %v1365_v63 = vld [vmem:[%s1557_s4] sm:$0xff]  ;;  %v459_v1 = vld [vmem:[%s1558_s2 + $0x8] sm:$0xff]  ;;  %v460_v2 = vld [vmem:[%s1558_s2 + $0x10] sm:$0xff] }
  0x17   :  { %893 = vmatpush3.msra.mxu0 %v83_v16  ;;  %946 = vmatprep.subr.mxu1 %v296_v25  ;;  %v458_v0 = vld [vmem:[%s1558_s2] sm:$0xff]  ;;  %v461_v3 = vld [vmem:[%s1558_s2 + $0x18] sm:$0xff]  ;;  %v463_v5 = vld [vmem:[%s1558_s2 + $0x28] sm:$0xff] }
  0x18   :  { %894 = vmatprep.subr.mxu0 %v82_v18  ;;  %947 = vmatpush3.msra.mxu1 %v296_v25  ;;  %v462_v4 = vld [vmem:[%s1558_s2 + $0x20] sm:$0xff]  ;;  %v464_v6 = vld [vmem:[%s1558_s2 + $0x30] sm:$0xff]  ;;  %v465_v7 = vld [vmem:[%s1558_s2 + $0x38] sm:$0xff] }
  0x19   :  { %895 = vmatpush3.msra.mxu0 %v82_v18  ;;  %948 = vmatprep.subr.mxu1 %v295_v27  ;;  %v467_v25 = vld [vmem:[%s1558_s2 + $0x48] sm:$0xff] }
  0x1a   :  { %896 = vmatprep.subr.mxu0 %v81_v20  ;;  %949 = vmatpush3.msra.mxu1 %v295_v27  ;;  %v469_v27 = vld [vmem:[%s1558_s2 + $0x58] sm:$0xff] }
  0x1b   :  { %897 = vmatpush3.msra.mxu0 %v81_v20  ;;  %950 = vmatprep.subr.mxu1 %v294_v32 }
  0x1c   :  { %898 = vmatprep.subr.mxu0 %v80_v22  ;;  %951 = vmatpush3.msra.mxu1 %v294_v32 }
  0x1d   :  { %899 = vmatpush3.msra.mxu0 %v80_v22  ;;  %952 = vmatprep.subr.mxu1 %v293_v37 }
  0x1e   :  { %900 = vmatprep.subr.mxu0 %v79_v24  ;;  %953 = vmatpush3.msra.mxu1 %v293_v37 }
  0x1f   :  { %901 = vmatpush3.msra.mxu0 %v79_v24  ;;  %954 = vmatprep.subr.mxu1 %v292_v42  ;;  %v466_v24 = vld [vmem:[%s1558_s2 + $0x40] sm:$0xff] }
  0x20   :  { %902 = vmatprep.subr.mxu0 %v78_v26  ;;  %955 = vmatpush3.msra.mxu1 %v292_v42 }
  0x21   :  { %903 = vmatpush3.msra.mxu0 %v78_v26  ;;  %956 = vmatprep.subr.mxu1 %v291_v47  ;;  %v468_v26 = vld [vmem:[%s1558_s2 + $0x50] sm:$0xff] }
  0x22   :  { %905 = vmatmul.mubr.f32.vlgmr.msra.gmra.mxu0 %v63_v28  ;;  %984 = vmatprep.subr.mxu0 %v1202_v29  ;;  %v470_v28 = vld [vmem:[%s1558_s2 + $0x60] sm:$0xff] }
  0x23   :  { %907 = vmatprep.mubr.f32.mxu0 %v64_v30  ;;  %985 = vmatpush3.msra.mxu0 %v1202_v29  ;;  %v472_v30 = vld [vmem:[%s1558_s2 + $0x70] sm:$0xff] }
  0x24   :  { %986 = vmatprep.subr.mxu0 %v1210_v31  ;;  %957 = vmatpush3.msra.mxu1 %v291_v47 }
  0x25   :  { %987 = vmatpush3.msra.mxu0 %v1210_v31  ;;  %958 = vmatprep.subr.mxu1 %v290_v61 }
  0x26   :  { %908 = vmatmul.mubr.f32.gmra.mxu0 %v65_v33  ;;  %988 = vmatprep.subr.mxu0 %v1223_v34 }
  0x27   :  { %910 = vmatprep.mubr.f32.mxu0 %v66_v35  ;;  %989 = vmatpush3.msra.mxu0 %v1223_v34  ;;  %v1451_v35 = vld [vmem:[%s1559_s5] ss:$0 sm:$0xff] }
  0x28   :  { %990 = vmatprep.subr.mxu0 %v1233_v36  ;;  %959 = vmatpush3.msra.mxu1 %v290_v61 }
  0x29   :  { %991 = vmatpush3.msra.mxu0 %v1233_v36  ;;  %1040 = vmatprep.subr.mxu1 %v1202_v29 }
  0x2a   :  { %911 = vmatmul.mubr.f32.gmra.mxu0 %v67_v38  ;;  %992 = vmatprep.subr.mxu0 %v1246_v39 }
  0x2b   :  { %913 = vmatprep.mubr.f32.mxu0 %v68_v40  ;;  %993 = vmatpush3.msra.mxu0 %v1246_v39  ;;  %v1457_v40 = vld [vmem:[%s1560_s6] ss:$0 sm:$0xff] }
  0x2c   :  { %994 = vmatprep.subr.mxu0 %v1256_v41 }
  0x2d   :  { %995 = vmatpush3.msra.mxu0 %v1256_v41 }
  0x2e   :  { %914 = vmatmul.mubr.f32.gmra.mxu0 %v69_v43  ;;  %996 = vmatprep.subr.mxu0 %v1269_v44 }
  0x2f   :  { %916 = vmatprep.mubr.f32.mxu0 %v70_v45  ;;  %997 = vmatpush3.msra.mxu0 %v1269_v44 }
  0x30   :  { %998 = vmatprep.subr.mxu0 %v1279_v46 }
  0x31   :  { %999 = vmatpush3.msra.mxu0 %v1279_v46 }
  0x32   :  { %917 = vmatmul.mubr.f32.gmra.mxu0 %v71_v48  ;;  %1000 = vmatprep.subr.mxu0 %v1292_v49 }
  0x33   :  { %919 = vmatprep.mubr.f32.mxu0 %v72_v50  ;;  %1001 = vmatpush3.msra.mxu0 %v1292_v49 }
  0x34   :  { %1002 = vmatprep.subr.mxu0 %v1302_v51 }
  0x35   :  { %1003 = vmatpush3.msra.mxu0 %v1302_v51 }
  0x36   :  { %920 = vmatmul.mubr.f32.gmra.mxu0 %v73_v52  ;;  %1004 = vmatprep.subr.mxu0 %v1312_v53 }
  0x37   :  { %922 = vmatprep.mubr.f32.mxu0 %v74_v54  ;;  %1005 = vmatpush3.msra.mxu0 %v1312_v53 }
  0x38   :  { %1006 = vmatprep.subr.mxu0 %v1322_v55 }
  0x39   :  { %1007 = vmatpush3.msra.mxu0 %v1322_v55 }
  0x3a   :  { %923 = vmatmul.mubr.f32.gmra.mxu0 %v75_v56  ;;  %1008 = vmatprep.subr.mxu0 %v1332_v57 }
  0x3b   :  { %925 = vmatprep.mubr.f32.mxu0 %v76_v58  ;;  %1009 = vmatpush3.msra.mxu0 %v1332_v57 }
  0x3c   :  { %1010 = vmatprep.subr.mxu0 %v1347_v60 }
  0x3d   :  { %1011 = vmatpush3.msra.mxu0 %v1347_v60 }
  0x3e   :  { %926 = vmatmul.mubr.f32.gmra.mxu0 %v77_v59  ;;  %1012 = vmatprep.subr.mxu0 %v1357_v62 }
  0x3f   :  { %1013 = vmatpush3.msra.mxu0 %v1357_v62  ;;  %1016 = vmatprep.mubr.f32.mxu0 %v458_v0 }
  0x40   :  { %1014 = vmatprep.subr.mxu0 %v1365_v63 }
  0x41   :  { %1015 = vmatpush3.msra.mxu0 %v1365_v63 }
  0x42   :  { %1017 = vmatmul.mubr.f32.vlgmr.msra.gmra.mxu0 %v459_v1 }
  0x43   :  { %1019 = vmatprep.mubr.f32.mxu0 %v460_v2 }
  0x46   :  { %1020 = vmatmul.mubr.f32.gmra.mxu0 %v461_v3 }
  0x47   :  { %1022 = vmatprep.mubr.f32.mxu0 %v462_v4 }
  0x4a   :  { %1023 = vmatmul.mubr.f32.gmra.mxu0 %v463_v5 }
  0x4b   :  { %1025 = vmatprep.mubr.f32.mxu0 %v464_v6 }
  0x4e   :  { %1026 = vmatmul.mubr.f32.gmra.mxu0 %v465_v7 }
  0xe2   :  { %v906_v8 = vpop.f32.mrf.mxu0 }
  0xe4   :  { %v160_v9 = vpop.f32.mrf.mxu0 }
  0xe5   :  { %960 = vmatprep.mubr.f32.mxu1 %v160_v9 }
  0xe6   :  { %v909_v10 = vpop.f32.mrf.mxu0  ;;  %961 = vmatmul.mubr.f32.vlgmr.msra.gmra.mxu1 %v906_v8 }
  0xe7   :  { %1056 = vmatpush3.msra.mxu1 %v1202_v29  ;;  %v471_v29 = vld [vmem:[%s1558_s2 + $0x68] sm:$0xff] }
  0xe8   :  { %1041 = vmatprep.subr.mxu1 %v1210_v31  ;;  %v170_v11 = vpop.f32.mrf.mxu0 }
  0xe9   :  { %1057 = vmatpush3.msra.mxu1 %v1210_v31  ;;  %963 = vmatprep.mubr.f32.mxu1 %v170_v11  ;;  %v473_v31 = vld [vmem:[%s1558_s2 + $0x78] sm:$0xff] }
  0xea   :  { %1042 = vmatprep.subr.mxu1 %v1223_v34  ;;  %v912_v12 = vpop.f32.mrf.mxu0  ;;  %964 = vmatmul.mubr.f32.gmra.mxu1 %v909_v10 }
  0xeb   :  { %1058 = vmatpush3.msra.mxu1 %v1223_v34 }
  0xec   :  { %1043 = vmatprep.subr.mxu1 %v1233_v36  ;;  %v180_v13 = vpop.f32.mrf.mxu0 }
  0xed   :  { %1059 = vmatpush3.msra.mxu1 %v1233_v36  ;;  %966 = vmatprep.mubr.f32.mxu1 %v180_v13 }
  0xee   :  { %1044 = vmatprep.subr.mxu1 %v1246_v39  ;;  %v915_v14 = vpop.f32.mrf.mxu0  ;;  %967 = vmatmul.mubr.f32.gmra.mxu1 %v912_v12 }
  0xef   :  { %1060 = vmatpush3.msra.mxu1 %v1246_v39 }
  0xf0   :  { %1045 = vmatprep.subr.mxu1 %v1256_v41  ;;  %v190_v15 = vpop.f32.mrf.mxu0 }
  0xf1   :  { %1061 = vmatpush3.msra.mxu1 %v1256_v41  ;;  %969 = vmatprep.mubr.f32.mxu1 %v190_v15 }
  0xf2   :  { %1046 = vmatprep.subr.mxu1 %v1269_v44  ;;  %v918_v16 = vpop.f32.mrf.mxu0  ;;  %970 = vmatmul.mubr.f32.gmra.mxu1 %v915_v14 }
  0xf3   :  { %1062 = vmatpush3.msra.mxu1 %v1269_v44 }
  0xf4   :  { %1047 = vmatprep.subr.mxu1 %v1279_v46  ;;  %v200_v17 = vpop.f32.mrf.mxu0 }
  0xf5   :  { %1063 = vmatpush3.msra.mxu1 %v1279_v46  ;;  %972 = vmatprep.mubr.f32.mxu1 %v200_v17 }
  0xf6   :  { %1048 = vmatprep.subr.mxu1 %v1292_v49  ;;  %v921_v18 = vpop.f32.mrf.mxu0  ;;  %973 = vmatmul.mubr.f32.gmra.mxu1 %v918_v16 }
  0xf7   :  { %1064 = vmatpush3.msra.mxu1 %v1292_v49 }
  0xf8   :  { %1049 = vmatprep.subr.mxu1 %v1302_v51  ;;  %v210_v19 = vpop.f32.mrf.mxu0 }
  0xf9   :  { %1065 = vmatpush3.msra.mxu1 %v1302_v51  ;;  %975 = vmatprep.mubr.f32.mxu1 %v210_v19 }
  0xfa   :  { %1050 = vmatprep.subr.mxu1 %v1312_v53  ;;  %v924_v20 = vpop.f32.mrf.mxu0  ;;  %976 = vmatmul.mubr.f32.gmra.mxu1 %v921_v18 }
  0xfb   :  { %1066 = vmatpush3.msra.mxu1 %v1312_v53 }
  0xfc   :  { %1051 = vmatprep.subr.mxu1 %v1322_v55  ;;  %v220_v21 = vpop.f32.mrf.mxu0 }
  0xfd   :  { %1067 = vmatpush3.msra.mxu1 %v1322_v55  ;;  %978 = vmatprep.mubr.f32.mxu1 %v220_v21 }
  0xfe   :  { %1052 = vmatprep.subr.mxu1 %v1332_v57  ;;  %v927_v22 = vpop.f32.mrf.mxu0  ;;  %979 = vmatmul.mubr.f32.gmra.mxu1 %v924_v20 }
  0xff   :  { %1068 = vmatpush3.msra.mxu1 %v1332_v57 }
 0x100   :  { %1053 = vmatprep.subr.mxu1 %v1347_v60  ;;  %v230_v23 = vpop.f32.mrf.mxu0 }
 0x101   :  { %1069 = vmatpush3.msra.mxu1 %v1347_v60  ;;  %981 = vmatprep.mubr.f32.mxu1 %v230_v23 }
 0x102   :  { %1054 = vmatprep.subr.mxu1 %v1357_v62  ;;  %982 = vmatmul.mubr.f32.gmra.mxu1 %v927_v22  ;;  %v1018_v32 = vpop.f32.mrf.mxu0 }
 0x103   :  { %1070 = vmatpush3.msra.mxu1 %v1357_v62  ;;  %1028 = vmatprep.mubr.f32.mxu1 %v466_v24 }
 0x104   :  { %1055 = vmatprep.subr.mxu1 %v1365_v63  ;;  %v556_v33 = vpop.f32.mrf.mxu0 }
 0x105   :  { %1071 = vmatpush3.msra.mxu1 %v1365_v63 }
 0x106   :  { %1029 = vmatmul.mubr.f32.vlgmr.msra.gmra.mxu1 %v467_v25  ;;  %v1021_v34 = vpop.f32.mrf.mxu0 }
 0x107   :  { %1031 = vmatprep.mubr.f32.mxu1 %v468_v26 }
 0x108   :  { %v566_v37 = vpop.f32.mrf.mxu0 }
 0x10a   :  { %1032 = vmatmul.mubr.f32.gmra.mxu1 %v469_v27  ;;  %v1024_v44 = vpop.f32.mrf.mxu0 }
 0x10b   :  { %1034 = vmatprep.mubr.f32.mxu1 %v470_v28 }
 0x10c   :  { %v576_v55 = vpop.f32.mrf.mxu0 }
 0x10e   :  { %1035 = vmatmul.mubr.f32.gmra.mxu1 %v471_v29  ;;  %v1027_v4 = vpop.f32.mrf.mxu0 }
 0x10f   :  { %1037 = vmatprep.mubr.f32.mxu1 %v472_v30 }
 0x110   :  { %v586_v19 = vpop.f32.mrf.mxu0 }
 0x112   :  { %1038 = vmatmul.mubr.f32.gmra.mxu1 %v473_v31 }
 0x1a6   :  { %v962_v36 = vpop.f32.mrf.mxu1 }
 0x1a7   :  { %v385_v38 = vadd.f32 %v962_v36, %v1451_v35 }
 0x1a8   :  { %v379_v39 = vpop.f32.mrf.mxu1 }
 0x1a9   :  { %v380_v41 = vadd.f32 %v1451_v35, %v379_v39  ;;  %v636_v42 = vadd.f32 %v1018_v32, %v385_v38 }
 0x1aa   :  { %v965_v43 = vpop.f32.mrf.mxu1 }
 0x1ab   :  { %vm653_vm0 = vcmp.ge.f32.partialorder %v636_v42, 0.0  ;;  %v675_v45 = vmul.f32 %v1457_v40, %v636_v42  ;;  %v395_v46 = vadd.f32 %v965_v43, %v1451_v35  ;;  %v635_v47 = vadd.f32 %v556_v33, %v380_v41 }
 0x1ac   :  { %v389_v48 = vpop.f32.mrf.mxu1 }
 0x1ad   :  { %v691_v49 = vsel %vm653_vm0, %v636_v42, %v675_v45  ;;  %vm652_vm1 = vcmp.ge.f32.partialorder %v635_v47, 0.0  ;;  %v674_v50 = vmul.f32 %v1457_v40, %v635_v47  ;;  %v390_v51 = vadd.f32 %v1451_v35, %v389_v48 }
 0x1ae   :  { %vm707_vm2 = vcmp.ge.f32.partialorder %v691_v49, 0.0  ;;  %v723_v52 = vmul.f32 %v1457_v40, %v691_v49  ;;  %v638_v53 = vadd.f32 %v1021_v34, %v395_v46  ;;  %v968_v54 = vpop.f32.mrf.mxu1 }
 0x1af   :  { %v690_v56 = vsel %vm652_vm1, %v635_v47, %v674_v50  ;;  %v405_v57 = vadd.f32 %v968_v54, %v1451_v35  ;;  %v637_v58 = vadd.f32 %v566_v37, %v390_v51 }
 0x1b0   :  { %v739_v59 = vsel %vm707_vm2, %v691_v49, %v723_v52  ;;  %vm706_vm3 = vcmp.ge.f32.partialorder %v690_v56, 0.0  ;;  %v722_v60 = vmul.f32 %v1457_v40, %v690_v56  ;;  %vm655_vm4 = vcmp.ge.f32.partialorder %v638_v53, 0.0  ;;  %v399_v61 = vpop.f32.mrf.mxu1 }
 0x1b1   :  { %755 = vst [vmem:[%s1561_s7 + $0x8] sm:$0xff] %v739_v59  ;;  %v677_v62 = vmul.f32 %v1457_v40, %v638_v53  ;;  %vm654_vm5 = vcmp.ge.f32.partialorder %v637_v58, 0.0  ;;  %v676_v63 = vmul.f32 %v1457_v40, %v637_v58  ;;  %v400_v0 = vadd.f32 %v1451_v35, %v399_v61 }
 0x1b2   :  { %v738_v1 = vsel %vm706_vm3, %v690_v56, %v722_v60  ;;  %v640_v2 = vadd.f32 %v1024_v44, %v405_v57  ;;  %v971_v3 = vpop.f32.mrf.mxu1 }
 0x1b3   :  { %754 = vst [vmem:[%s1561_s7] sm:$0xff] %v738_v1  ;;  %v693_v5 = vsel %vm655_vm4, %v638_v53, %v677_v62  ;;  %v692_v6 = vsel %vm654_vm5, %v637_v58, %v676_v63  ;;  %v415_v7 = vadd.f32 %v971_v3, %v1451_v35  ;;  %v639_v8 = vadd.f32 %v576_v55, %v400_v0 }
 0x1b4   :  { %vm709_vm6 = vcmp.ge.f32.partialorder %v693_v5, 0.0  ;;  %v725_v9 = vmul.f32 %v1457_v40, %v693_v5  ;;  %vm708_vm7 = vcmp.ge.f32.partialorder %v692_v6, 0.0  ;;  %v724_v10 = vmul.f32 %v1457_v40, %v692_v6  ;;  %v409_v11 = vpop.f32.mrf.mxu1 }
 0x1b5   :  { %vm657_vm8 = vcmp.ge.f32.partialorder %v640_v2, 0.0  ;;  %v679_v12 = vmul.f32 %v1457_v40, %v640_v2  ;;  %vm656_vm9 = vcmp.ge.f32.partialorder %v639_v8, 0.0  ;;  %v678_v13 = vmul.f32 %v1457_v40, %v639_v8 }
 0x1b6   :  { %v741_v14 = vsel %vm709_vm6, %v693_v5, %v725_v9  ;;  %v740_v15 = vsel %vm708_vm7, %v692_v6, %v724_v10  ;;  %v410_v16 = vadd.f32 %v1451_v35, %v409_v11  ;;  %v642_v17 = vadd.f32 %v1027_v4, %v415_v7  ;;  %v974_v18 = vpop.f32.mrf.mxu1 }
 0x1b7   :  { %757 = vst [vmem:[%s1561_s7 + $0x18] sm:$0xff] %v741_v14  ;;  %756 = vst [vmem:[%s1561_s7 + $0x10] sm:$0xff] %v740_v15  ;;  %v695_v20 = vsel %vm657_vm8, %v640_v2, %v679_v12  ;;  %v694_v21 = vsel %vm656_vm9, %v639_v8, %v678_v13  ;;  %v425_v44 = vadd.f32 %v974_v18, %v1451_v35 }
 0x1b8   :  { %vm711_vm10 = vcmp.ge.f32.partialorder %v695_v20, 0.0  ;;  %v727_v22 = vmul.f32 %v1457_v40, %v695_v20  ;;  %vm710_vm11 = vcmp.ge.f32.partialorder %v694_v21, 0.0  ;;  %v726_v23 = vmul.f32 %v1457_v40, %v694_v21  ;;  %v419_v24 = vpop.f32.mrf.mxu1 }
 0x1b9   :  { %vm659_vm12 = vcmp.ge.f32.partialorder %v642_v17, 0.0  ;;  %v681_v25 = vmul.f32 %v1457_v40, %v642_v17  ;;  %v641_v26 = vadd.f32 %v586_v19, %v410_v16  ;;  %v420_v46 = vadd.f32 %v1451_v35, %v419_v24 }
 0x1ba   :  { %v743_v27 = vsel %vm711_vm10, %v695_v20, %v727_v22  ;;  %v742_v28 = vsel %vm710_vm11, %v694_v21, %v726_v23  ;;  %v977_v29 = vpop.f32.mrf.mxu1 }
 0x1bb   :  { %759 = vst [vmem:[%s1561_s7 + $0x28] sm:$0xff] %v743_v27  ;;  %758 = vst [vmem:[%s1561_s7 + $0x20] sm:$0xff] %v742_v28  ;;  %v697_v30 = vsel %vm659_vm12, %v642_v17, %v681_v25  ;;  %vm658_vm13 = vcmp.ge.f32.partialorder %v641_v26, 0.0  ;;  %v680_v31 = vmul.f32 %v1457_v40, %v641_v26  ;;  %v435_v49 = vadd.f32 %v977_v29, %v1451_v35 }
 0x1bc   :  { %vm713_vm14 = vcmp.ge.f32.partialorder %v697_v30, 0.0  ;;  %v729_v32 = vmul.f32 %v1457_v40, %v697_v30  ;;  %v429_v33 = vpop.f32.mrf.mxu1 }
 0x1bd   :  { %v696_v34 = vsel %vm658_vm13, %v641_v26, %v680_v31  ;;  %v430_v52 = vadd.f32 %v1451_v35, %v429_v33 }
 0x1be   :  { %v745_v36 = vsel %vm713_vm14, %v697_v30, %v729_v32  ;;  %vm712_vm15 = vcmp.ge.f32.partialorder %v696_v34, 0.0  ;;  %v728_v37 = vmul.f32 %v1457_v40, %v696_v34  ;;  %v980_v38 = vpop.f32.mrf.mxu1 }
 0x1bf   :  { %761 = vst [vmem:[%s1561_s7 + $0x38] sm:$0xff] %v745_v36  ;;  %v445_v57 = vadd.f32 %v980_v38, %v1451_v35 }
 0x1c0   :  { %v744_v39 = vsel %vm712_vm15, %v696_v34, %v728_v37  ;;  %v439_v41 = vpop.f32.mrf.mxu1 }
 0x1c1   :  { %760 = vst [vmem:[%s1561_s7 + $0x30] sm:$0xff] %v744_v39  ;;  %v440_v63 = vadd.f32 %v1451_v35, %v439_v41 }
 0x1c2   :  { %v983_v42 = vpop.f32.mrf.mxu1 }
 0x1c3   :  { %v455_v6 = vadd.f32 %v983_v42, %v1451_v35 }
 0x1c4   :  { %v449_v43 = vpop.f32.mrf.mxu1 }
 0x1c5   :  { %v450_v13 = vadd.f32 %v1451_v35, %v449_v43 }
 0x1c6   :  { %v1030_v45 = vpop.f32.mrf.mxu1 }
 0x1c7   :  { %v644_v47 = vadd.f32 %v1030_v45, %v425_v44 }
 0x1c8   :  { %v596_v48 = vpop.f32.mrf.mxu1 }
 0x1c9   :  { %vm661_vm0 = vcmp.ge.f32.partialorder %v644_v47, 0.0  ;;  %v683_v50 = vmul.f32 %v1457_v40, %v644_v47  ;;  %v643_v51 = vadd.f32 %v596_v48, %v420_v46 }
 0x1ca   :  { %v1033_v53 = vpop.f32.mrf.mxu1 }
 0x1cb   :  { %v699_v54 = vsel %vm661_vm0, %v644_v47, %v683_v50  ;;  %vm660_vm1 = vcmp.ge.f32.partialorder %v643_v51, 0.0  ;;  %v682_v55 = vmul.f32 %v1457_v40, %v643_v51  ;;  %v646_v56 = vadd.f32 %v1033_v53, %v435_v49 }
 0x1cc   :  { %vm715_vm2 = vcmp.ge.f32.partialorder %v699_v54, 0.0  ;;  %v731_v58 = vmul.f32 %v1457_v40, %v699_v54  ;;  %v606_v59 = vpop.f32.mrf.mxu1 }
 0x1cd   :  { %v698_v60 = vsel %vm660_vm1, %v643_v51, %v682_v55  ;;  %vm663_vm3 = vcmp.ge.f32.partialorder %v646_v56, 0.0  ;;  %v685_v61 = vmul.f32 %v1457_v40, %v646_v56  ;;  %v645_v62 = vadd.f32 %v606_v59, %v430_v52 }
 0x1ce   :  { %v747_v0 = vsel %vm715_vm2, %v699_v54, %v731_v58  ;;  %vm714_vm4 = vcmp.ge.f32.partialorder %v698_v60, 0.0  ;;  %v730_v1 = vmul.f32 %v1457_v40, %v698_v60  ;;  %v1036_v2 = vpop.f32.mrf.mxu1 }
 0x1cf   :  { %763 = vst [vmem:[%s1561_s7 + $0x48] sm:$0xff] %v747_v0  ;;  %v701_v3 = vsel %vm663_vm3, %v646_v56, %v685_v61  ;;  %vm662_vm5 = vcmp.ge.f32.partialorder %v645_v62, 0.0  ;;  %v684_v4 = vmul.f32 %v1457_v40, %v645_v62  ;;  %v648_v5 = vadd.f32 %v1036_v2, %v445_v57 }
 0x1d0   :  { %v746_v7 = vsel %vm714_vm4, %v698_v60, %v730_v1  ;;  %vm717_vm6 = vcmp.ge.f32.partialorder %v701_v3, 0.0  ;;  %v733_v8 = vmul.f32 %v1457_v40, %v701_v3  ;;  %v616_v9 = vpop.f32.mrf.mxu1 }
 0x1d1   :  { %762 = vst [vmem:[%s1561_s7 + $0x40] sm:$0xff] %v746_v7  ;;  %v700_v10 = vsel %vm662_vm5, %v645_v62, %v684_v4  ;;  %vm665_vm7 = vcmp.ge.f32.partialorder %v648_v5, 0.0  ;;  %v687_v11 = vmul.f32 %v1457_v40, %v648_v5  ;;  %v647_v12 = vadd.f32 %v616_v9, %v440_v63 }
 0x1d2   :  { %v749_v14 = vsel %vm717_vm6, %v701_v3, %v733_v8  ;;  %vm716_vm8 = vcmp.ge.f32.partialorder %v700_v10, 0.0  ;;  %v732_v15 = vmul.f32 %v1457_v40, %v700_v10  ;;  %v1039_v16 = vpop.f32.mrf.mxu1 }
 0x1d3   :  { %765 = vst [vmem:[%s1561_s7 + $0x58] sm:$0xff] %v749_v14  ;;  %v703_v17 = vsel %vm665_vm7, %v648_v5, %v687_v11  ;;  %vm664_vm9 = vcmp.ge.f32.partialorder %v647_v12, 0.0  ;;  %v686_v18 = vmul.f32 %v1457_v40, %v647_v12  ;;  %v650_v19 = vadd.f32 %v1039_v16, %v455_v6 }
 0x1d4   :  { %v748_v20 = vsel %vm716_vm8, %v700_v10, %v732_v15  ;;  %vm719_vm10 = vcmp.ge.f32.partialorder %v703_v17, 0.0  ;;  %v735_v21 = vmul.f32 %v1457_v40, %v703_v17  ;;  %v626_v22 = vpop.f32.mrf.mxu1 }
 0x1d5   :  { %764 = vst [vmem:[%s1561_s7 + $0x50] sm:$0xff] %v748_v20  ;;  %v702_v35 = vsel %vm664_vm9, %v647_v12, %v686_v18  ;;  %vm667_vm11 = vcmp.ge.f32.partialorder %v650_v19, 0.0  ;;  %v689_v23 = vmul.f32 %v1457_v40, %v650_v19  ;;  %v649_v24 = vadd.f32 %v626_v22, %v450_v13 }
 0x1d6   :  { %v751_v25 = vsel %vm719_vm10, %v703_v17, %v735_v21  ;;  %vm718_vm12 = vcmp.ge.f32.partialorder %v702_v35, 0.0  ;;  %v734_v26 = vmul.f32 %v1457_v40, %v702_v35 }
 0x1d7   :  { %767 = vst [vmem:[%s1561_s7 + $0x68] sm:$0xff] %v751_v25  ;;  %v705_v27 = vsel %vm667_vm11, %v650_v19, %v689_v23  ;;  %vm666_vm13 = vcmp.ge.f32.partialorder %v649_v24, 0.0  ;;  %v688_v28 = vmul.f32 %v1457_v40, %v649_v24 }
 0x1d8   :  { %v750_v29 = vsel %vm718_vm12, %v702_v35, %v734_v26  ;;  %vm721_vm14 = vcmp.ge.f32.partialorder %v705_v27, 0.0  ;;  %v737_v30 = vmul.f32 %v1457_v40, %v705_v27 }
 0x1d9   :  { %766 = vst [vmem:[%s1561_s7 + $0x60] sm:$0xff] %v750_v29  ;;  %v704_v31 = vsel %vm666_vm13, %v649_v24, %v688_v28 }
 0x1da   :  { %v753_v32 = vsel %vm721_vm14, %v705_v27, %v737_v30  ;;  %vm720_vm15 = vcmp.ge.f32.partialorder %v704_v31, 0.0  ;;  %v736_v33 = vmul.f32 %v1457_v40, %v704_v31 }
 0x1db   :  { %769 = vst [vmem:[%s1561_s7 + $0x78] sm:$0xff] %v753_v32 }
 0x1dc   :  { %v752_v34 = vsel %vm720_vm15, %v704_v31, %v736_v33 }
 0x1dd   :  { %768 = vst [vmem:[%s1561_s7 + $0x70] sm:$0xff] %v752_v34 }

</bundles_post_ra>
